<compile_context>
chip_gen: v6e
topology: v6e:2x2x1
jax: 0.10.0
libtpu: 0.0.40
codegen_flags: <defaults>
</compile_context>

<pallas_src>
import functools

import jax
import jax.numpy as jnp
from jax.experimental import pallas as pl
from jax.experimental.pallas import tpu as pltpu


def _resdwc_kernel(x_ref, w_ref, o_ref, *, H, W):
    """out = x + bias + depthwise_conv3x3(x), one (b, c) image per row.

    x_ref: (R, H*W)    rows are flattened NCHW images (lane axis = H*W)
    w_ref: (10, R, 1)  taps 0..8 in (ky, kx) row-major order; tap 4 already has
                       +1 folded in (residual); slab 9 = conv bias
    o_ref: (R, H*W)
    """
    x = x_ref[...]
    HW = x.shape[-1]

    # Lane-position bookkeeping, built once per block at (1, HW); broadcasts
    # along the row (sublane) axis in the multiplies below.
    p = jax.lax.broadcasted_iota(jnp.int32, (1, HW), 1)
    col = p % W
    keep_l = (col > 0).astype(x.dtype)            # left  neighbour exists (j-1 >= 0)
    keep_r = (col < W - 1).astype(x.dtype)        # right neighbour exists (j+1 <  W)
    keep_t = (p >= W).astype(x.dtype)             # row above exists       (i-1 >= 0)
    keep_b = (p < (H - 1) * W).astype(x.dtype)    # row below exists       (i+1 <  H)

    def wk(k):                                    # per-channel tap, (R, 1) -> broadcasts over lanes
        return w_ref[k]

    # Horizontal neighbours via XLU lane rolls + edge masks (zero padding in-register).
    x_l = pltpu.roll(x, 1, axis=1) * keep_l       # x[.., i, j-1]
    x_r = pltpu.roll(x, HW - 1, axis=1) * keep_r  # x[.., i, j+1]

    # Horizontal-then-vertical accumulation: 3 per-row sums, 2 vertical shifts.
    h_top = x_l * wk(0) + x * wk(1) + x_r * wk(2)      # kernel row ky = 0
    h_mid = x_l * wk(3) + x * wk(4) + x_r * wk(5)      # ky = 1 (center tap carries +1 residual)
    h_bot = x_l * wk(6) + x * wk(7) + x_r * wk(8)      # ky = 2

    v_top = pltpu.roll(h_top, W, axis=1) * keep_t      # contribution from row i-1
    v_bot = pltpu.roll(h_bot, HW - W, axis=1) * keep_b  # contribution from row i+1

    o_ref[...] = h_mid + wk(9) + v_top + v_bot


def resdwc(x, weight, bias, *, tiny_bytes=256 * 1024, target_block_bytes=512 * 1024):
    """x + depthwise_conv3x3(x) (stride 1, zero pad 1, groups=C) + bias.

    x: (B, C, H, W) NCHW (same layout in and out, no transposes),
    weight: (C, 1, 3, 3), bias: (C,).  Computes in x.dtype.
    """
    B, C, H, W = x.shape
    HW = H * W
    rows = B * C
    dtype = x.dtype

    # Free, layout-preserving reshape: each (b, c) image becomes one lane-dense row.
    x2 = x.reshape(rows, HW)

    # Per-channel taps (ky*3 + kx order) + conv bias, residual folded into the
    # center tap.  Shaped (10, rows, 1) so the kernel reads each tap as an (R, 1)
    # column that broadcasts along the lane (H*W) axis.  Tiny host-side prep.
    w9 = weight.reshape(C, 9).astype(dtype)
    w9 = w9 + (jnp.arange(9) == 4).astype(dtype)[None, :]
    wb = jnp.concatenate([w9, bias.reshape(C, 1).astype(dtype)], axis=1)   # (C, 10)
    wb = jnp.broadcast_to(wb[None], (B, C, 10)).reshape(rows, 10)
    wb = jnp.transpose(wb, (1, 0))[:, :, None]                             # (10, rows, 1)

    # Row-block selection: single block only for truly tiny inputs; otherwise
    # ~target_block_bytes per block, sublane-aligned, with >= 2 grid steps so the
    # pipeline overlaps DMA/compute (and both v7x TensorCores get work).
    itemsize = jnp.dtype(dtype).itemsize
    bytes_per_row = HW * itemsize
    total_bytes = rows * bytes_per_row
    if total_bytes <= tiny_bytes or rows < 16:
        r_blk = rows
    else:
        r_blk = min(rows // 2, max(1, target_block_bytes // bytes_per_row))
        r_blk = max(8, (r_blk // 8) * 8)
    grid = (pl.cdiv(rows, r_blk),)
    # TODO(synk): also tile the H axis (lane-axis split with a one-row halo) once a
    # single (row, H*W) stripe no longer fits the per-block budget.

    out2 = pl.pallas_call(
        functools.partial(_resdwc_kernel, H=H, W=W),
        grid=grid,
        in_specs=[
            pl.BlockSpec((r_blk, HW), lambda i: (i, 0)),
            pl.BlockSpec((10, r_blk, 1), lambda i: (0, i, 0)),
        ],
        out_specs=pl.BlockSpec((r_blk, HW), lambda i: (i, 0)),
        out_shape=jax.ShapeDtypeStruct((rows, HW), dtype),
        compiler_params=pltpu.CompilerParams(
            dimension_semantics=("parallel",),
            vmem_limit_bytes=32 * 1024 * 1024,
        ),
    )(x2, wb)
    return out2.reshape(B, C, H, W)


def resdwc_reference(x, weight, bias):
    """Pure-JAX reference: x + depthwise conv3x3 (zero pad) + bias."""
    C = x.shape[1]
    y = jax.lax.conv_general_dilated(
        x.astype(jnp.float32), weight.astype(jnp.float32),
        window_strides=(1, 1), padding=((1, 1), (1, 1)),
        dimension_numbers=("NCHW", "OIHW", "NCHW"),
        feature_group_count=C, precision=jax.lax.Precision.HIGHEST)
    return x.astype(jnp.float32) + y + bias.astype(jnp.float32)[None, :, None, None]


if __name__ == "__main__":
    B, C, H, W = 2, 32, 16, 16           # dim=32, spatial 16x16, batch 2
    key = jax.random.PRNGKey(0)
    kx, kw, kb = jax.random.split(key, 3)
    x = jax.random.normal(kx, (B, C, H, W), jnp.float32)
    weight = jax.random.normal(kw, (C, 1, 3, 3), jnp.float32) * 0.2
    bias = jax.random.normal(kb, (C,), jnp.float32) * 0.1

    fwd = jax.jit(resdwc)
    out = fwd(x, weight, bias)
    jax.block_until_ready(out)

    assert out.shape == (B, C, H, W)
    assert bool(jnp.all(jnp.isfinite(out)))
    ref = resdwc_reference(x, weight, bias)
    max_err = float(jnp.max(jnp.abs(out - ref)))
    assert max_err < 1e-4, max_err
    print("KERNEL_OK")
</pallas_src>

<mosaic_0001>
module attributes {stable_mosaic.version = 11 : i64} {
  func.func @_resdwc_kernel(%arg0: i32, %arg1: memref<64x256xf32, #tpu.memory_space<vmem>>, %arg2: memref<10x64x1xf32, #tpu.memory_space<vmem>>, %arg3: memref<64x256xf32, #tpu.memory_space<vmem>>) attributes {dimension_semantics = [#tpu.dimension_semantics<parallel>], iteration_bounds = array<i64: 1>, scalar_prefetch = 0 : i64, scratch_operands = 0 : i64, tpu.core_type = #tpu.core_type<tc>, window_params = [{transform_indices = @transform_0, window_bounds = array<i64: 64, 256>}, {transform_indices = @transform_1, window_bounds = array<i64: 10, 64, 1>}, {transform_indices = @transform_2, window_bounds = array<i64: 64, 256>}]} {
    %c0 = arith.constant 0 : index
    %c0_0 = arith.constant 0 : index
    %0 = vector.load %arg1[%c0, %c0_0] : memref<64x256xf32, #tpu.memory_space<vmem>>, vector<64x256xf32>
    %1 = tpu.iota {dimensions = array<i32: 1>} : vector<1x256xi32>
    %c16_i32 = arith.constant 16 : i32
    %c0_i32 = arith.constant 0 : i32
    %2 = arith.cmpi eq, %c16_i32, %c0_i32 : i32
    %c1_i32 = arith.constant 1 : i32
    %3 = arith.select %2, %c1_i32, %c16_i32 : i32
    %4 = vector.broadcast %3 : i32 to vector<1x256xi32>
    %5 = arith.remsi %1, %4 : vector<1x256xi32>
    %c0_i32_1 = arith.constant 0 : i32
    %6 = vector.broadcast %c0_i32_1 : i32 to vector<1x256xi32>
    %7 = arith.cmpi ne, %5, %6 : vector<1x256xi32>
    %c0_i32_2 = arith.constant 0 : i32
    %8 = vector.broadcast %c0_i32_2 : i32 to vector<1x256xi32>
    %9 = arith.cmpi slt, %5, %8 : vector<1x256xi32>
    %c0_i32_3 = arith.constant 0 : i32
    %10 = arith.cmpi slt, %3, %c0_i32_3 : i32
    %11 = vector.broadcast %10 : i1 to vector<1x256xi1>
    %12 = vector.broadcast %11 : vector<1x256xi1> to vector<1x256xi1>
    %13 = arith.xori %9, %12 : vector<1x256xi1>
    %14 = arith.andi %13, %7 : vector<1x256xi1>
    %15 = vector.broadcast %3 : i32 to vector<1x256xi32>
    %16 = arith.addi %5, %15 : vector<1x256xi32>
    %17 = arith.select %14, %16, %5 : vector<1x256xi1>, vector<1x256xi32>
    %c0_i32_4 = arith.constant 0 : i32
    %18 = vector.broadcast %c0_i32_4 : i32 to vector<1x256xi32>
    %19 = arith.cmpi sgt, %17, %18 : vector<1x256xi32>
    %20 = arith.extui %19 : vector<1x256xi1> to vector<1x256xi32>
    %21 = arith.sitofp %20 : vector<1x256xi32> to vector<1x256xf32>
    %c15_i32 = arith.constant 15 : i32
    %22 = vector.broadcast %c15_i32 : i32 to vector<1x256xi32>
    %23 = arith.cmpi slt, %17, %22 : vector<1x256xi32>
    %24 = arith.extui %23 : vector<1x256xi1> to vector<1x256xi32>
    %25 = arith.sitofp %24 : vector<1x256xi32> to vector<1x256xf32>
    %c16_i32_5 = arith.constant 16 : i32
    %26 = vector.broadcast %c16_i32_5 : i32 to vector<1x256xi32>
    %27 = arith.cmpi sge, %1, %26 : vector<1x256xi32>
    %28 = arith.extui %27 : vector<1x256xi1> to vector<1x256xi32>
    %29 = arith.sitofp %28 : vector<1x256xi32> to vector<1x256xf32>
    %c240_i32 = arith.constant 240 : i32
    %30 = vector.broadcast %c240_i32 : i32 to vector<1x256xi32>
    %31 = arith.cmpi slt, %1, %30 : vector<1x256xi32>
    %32 = arith.extui %31 : vector<1x256xi1> to vector<1x256xi32>
    %33 = arith.sitofp %32 : vector<1x256xi32> to vector<1x256xf32>
    %c1_i32_6 = arith.constant 1 : i32
    %34 = tpu.dynamic_rotate %0 by %c1_i32_6 dim 1 : vector<64x256xf32>, i32 -> vector<64x256xf32>
    %35 = vector.broadcast %21 : vector<1x256xf32> to vector<64x256xf32>
    %36 = arith.mulf %34, %35 : vector<64x256xf32>
    %c255_i32 = arith.constant 255 : i32
    %37 = tpu.dynamic_rotate %0 by %c255_i32 dim 1 : vector<64x256xf32>, i32 -> vector<64x256xf32>
    %38 = vector.broadcast %25 : vector<1x256xf32> to vector<64x256xf32>
    %39 = arith.mulf %37, %38 : vector<64x256xf32>
    %c0_7 = arith.constant 0 : index
    %c0_8 = arith.constant 0 : index
    %c0_9 = arith.constant 0 : index
    %40 = vector.load %arg2[%c0_7, %c0_8, %c0_9] : memref<10x64x1xf32, #tpu.memory_space<vmem>>, vector<1x64x1xf32>
    %41 = vector.shape_cast %40 : vector<1x64x1xf32> to vector<64x1xf32>
    %42 = vector.broadcast %41 : vector<64x1xf32> to vector<64x256xf32>
    %43 = arith.mulf %36, %42 : vector<64x256xf32>
    %c1 = arith.constant 1 : index
    %c0_10 = arith.constant 0 : index
    %c0_11 = arith.constant 0 : index
    %44 = vector.load %arg2[%c1, %c0_10, %c0_11] : memref<10x64x1xf32, #tpu.memory_space<vmem>>, vector<1x64x1xf32>
    %45 = vector.shape_cast %44 : vector<1x64x1xf32> to vector<64x1xf32>
    %46 = vector.broadcast %45 : vector<64x1xf32> to vector<64x256xf32>
    %47 = arith.mulf %0, %46 : vector<64x256xf32>
    %48 = arith.addf %43, %47 : vector<64x256xf32>
    %c2 = arith.constant 2 : index
    %c0_12 = arith.constant 0 : index
    %c0_13 = arith.constant 0 : index
    %49 = vector.load %arg2[%c2, %c0_12, %c0_13] : memref<10x64x1xf32, #tpu.memory_space<vmem>>, vector<1x64x1xf32>
    %50 = vector.shape_cast %49 : vector<1x64x1xf32> to vector<64x1xf32>
    %51 = vector.broadcast %50 : vector<64x1xf32> to vector<64x256xf32>
    %52 = arith.mulf %39, %51 : vector<64x256xf32>
    %53 = arith.addf %48, %52 : vector<64x256xf32>
    %c3 = arith.constant 3 : index
    %c0_14 = arith.constant 0 : index
    %c0_15 = arith.constant 0 : index
    %54 = vector.load %arg2[%c3, %c0_14, %c0_15] : memref<10x64x1xf32, #tpu.memory_space<vmem>>, vector<1x64x1xf32>
    %55 = vector.shape_cast %54 : vector<1x64x1xf32> to vector<64x1xf32>
    %56 = vector.broadcast %55 : vector<64x1xf32> to vector<64x256xf32>
    %57 = arith.mulf %36, %56 : vector<64x256xf32>
    %c4 = arith.constant 4 : index
    %c0_16 = arith.constant 0 : index
    %c0_17 = arith.constant 0 : index
    %58 = vector.load %arg2[%c4, %c0_16, %c0_17] : memref<10x64x1xf32, #tpu.memory_space<vmem>>, vector<1x64x1xf32>
    %59 = vector.shape_cast %58 : vector<1x64x1xf32> to vector<64x1xf32>
    %60 = vector.broadcast %59 : vector<64x1xf32> to vector<64x256xf32>
    %61 = arith.mulf %0, %60 : vector<64x256xf32>
    %62 = arith.addf %57, %61 : vector<64x256xf32>
    %c5 = arith.constant 5 : index
    %c0_18 = arith.constant 0 : index
    %c0_19 = arith.constant 0 : index
    %63 = vector.load %arg2[%c5, %c0_18, %c0_19] : memref<10x64x1xf32, #tpu.memory_space<vmem>>, vector<1x64x1xf32>
    %64 = vector.shape_cast %63 : vector<1x64x1xf32> to vector<64x1xf32>
    %65 = vector.broadcast %64 : vector<64x1xf32> to vector<64x256xf32>
    %66 = arith.mulf %39, %65 : vector<64x256xf32>
    %67 = arith.addf %62, %66 : vector<64x256xf32>
    %c6 = arith.constant 6 : index
    %c0_20 = arith.constant 0 : index
    %c0_21 = arith.constant 0 : index
    %68 = vector.load %arg2[%c6, %c0_20, %c0_21] : memref<10x64x1xf32, #tpu.memory_space<vmem>>, vector<1x64x1xf32>
    %69 = vector.shape_cast %68 : vector<1x64x1xf32> to vector<64x1xf32>
    %70 = vector.broadcast %69 : vector<64x1xf32> to vector<64x256xf32>
    %71 = arith.mulf %36, %70 : vector<64x256xf32>
    %c7 = arith.constant 7 : index
    %c0_22 = arith.constant 0 : index
    %c0_23 = arith.constant 0 : index
    %72 = vector.load %arg2[%c7, %c0_22, %c0_23] : memref<10x64x1xf32, #tpu.memory_space<vmem>>, vector<1x64x1xf32>
    %73 = vector.shape_cast %72 : vector<1x64x1xf32> to vector<64x1xf32>
    %74 = vector.broadcast %73 : vector<64x1xf32> to vector<64x256xf32>
    %75 = arith.mulf %0, %74 : vector<64x256xf32>
    %76 = arith.addf %71, %75 : vector<64x256xf32>
    %c8 = arith.constant 8 : index
    %c0_24 = arith.constant 0 : index
    %c0_25 = arith.constant 0 : index
    %77 = vector.load %arg2[%c8, %c0_24, %c0_25] : memref<10x64x1xf32, #tpu.memory_space<vmem>>, vector<1x64x1xf32>
    %78 = vector.shape_cast %77 : vector<1x64x1xf32> to vector<64x1xf32>
    %79 = vector.broadcast %78 : vector<64x1xf32> to vector<64x256xf32>
    %80 = arith.mulf %39, %79 : vector<64x256xf32>
    %81 = arith.addf %76, %80 : vector<64x256xf32>
    %c16_i32_26 = arith.constant 16 : i32
    %82 = tpu.dynamic_rotate %53 by %c16_i32_26 dim 1 : vector<64x256xf32>, i32 -> vector<64x256xf32>
    %83 = vector.broadcast %29 : vector<1x256xf32> to vector<64x256xf32>
    %84 = arith.mulf %82, %83 : vector<64x256xf32>
    %c240_i32_27 = arith.constant 240 : i32
    %85 = tpu.dynamic_rotate %81 by %c240_i32_27 dim 1 : vector<64x256xf32>, i32 -> vector<64x256xf32>
    %86 = vector.broadcast %33 : vector<1x256xf32> to vector<64x256xf32>
    %87 = arith.mulf %85, %86 : vector<64x256xf32>
    %c9 = arith.constant 9 : index
    %c0_28 = arith.constant 0 : index
    %c0_29 = arith.constant 0 : index
    %88 = vector.load %arg2[%c9, %c0_28, %c0_29] : memref<10x64x1xf32, #tpu.memory_space<vmem>>, vector<1x64x1xf32>
    %89 = vector.shape_cast %88 : vector<1x64x1xf32> to vector<64x1xf32>
    %90 = vector.broadcast %89 : vector<64x1xf32> to vector<64x256xf32>
    %91 = arith.addf %67, %90 : vector<64x256xf32>
    %92 = arith.addf %91, %84 : vector<64x256xf32>
    %93 = arith.addf %92, %87 : vector<64x256xf32>
    %c0_30 = arith.constant 0 : index
    %c0_31 = arith.constant 0 : index
    %94 = vector.load %arg3[%c0_30, %c0_31] : memref<64x256xf32, #tpu.memory_space<vmem>>, vector<64x256xf32>
    tpu.vector_store %arg3[%c0_30, %c0_31], %93 {strides = array<i32>} : memref<64x256xf32, #tpu.memory_space<vmem>>, vector<64x256xf32>,
    return
  }
  func.func @transform_0(%arg0: i32) -> (i32, i32) {
    %c0_i32 = arith.constant 0 : i32
    %c0_i32_0 = arith.constant 0 : i32
    return %arg0, %c0_i32 : i32, i32
  }
  func.func @transform_1(%arg0: i32) -> (i32, i32, i32) {
    %c0_i32 = arith.constant 0 : i32
    %c0_i32_0 = arith.constant 0 : i32
    %c0_i32_1 = arith.constant 0 : i32
    return %c0_i32, %arg0, %c0_i32_0 : i32, i32, i32
  }
  func.func @transform_2(%arg0: i32) -> (i32, i32) {
    %c0_i32 = arith.constant 0 : i32
    %c0_i32_0 = arith.constant 0 : i32
    return %arg0, %c0_i32 : i32, i32
  }
}

</mosaic_0001>

<bundles_post_ra>
// kernel: resdwc.1
= control target key start
LH: loop header
LB: loop body
LE: loop exit
PB: predicated region body
PF: predicated region fallthrough
CT: control target
= control target key end

     0   :  { %v1237_v2 = vmov 0   ;;  %s1238_s13 = smov 1   ;;  %s1239_s15 = smov 127   ;;  %s2603_s0 = inlined_call_operand.vmem [shape: f32[64,256], index: 0, kind: input, shape index: {}]   ;;  %s2604_s1 = inlined_call_operand.vmem [shape: f32[10,64,1], index: 1, kind: input, shape index: {}]   ;;  %s2605_s2 = inlined_call_operand.vmem [shape: f32[64,256], index: 2, kind: output, shape index: {}]  }
   0x1   :  { %v1261_v0 = vld [vmem:[%s2603_s0 + $0x20] sm:$0xff]  ;;  %1220 = vset.pattern.permute.xlu1 %v1237_v2  ;;  %1219 = vset.pattern.permute.xlu0 %v1237_v2  ;;  %v1273_v3 = vld [vmem:[%s2603_s0 + $0x30] sm:$0xff]  ;;  %v1309_v9 = vld [vmem:[%s2603_s0 + $0x18] sm:$0xff]  ;;  %s1241_s19 = smov 16   ;;  %s1242_s17 = smov 112  }
   0x2   :  { %2681 = vst [vmem:[#allocation2_spill] sm:$0xff] %v1261_v0  ;;  %v1266_v1 = vld [vmem:[%s2603_s0] sm:$0xff]  ;;  %82 = vrot.lane.b32.xlu1 %v1261_v0, %s1238_s13  ;;  %2683 = vst [vmem:[#allocation4_spill] sm:$0xff] %v1273_v3  ;;  %v1278_v4 = vld [vmem:[%s2603_s0 + $0x10] sm:$0xff] }
   0x3   :  { %2682 = vst [vmem:[#allocation3_spill] sm:$0xff] %v1266_v1  ;;  %78 = vrot.lane.b32.xlu0 %v1266_v1, %s1238_s13  ;;  %2684 = vst [vmem:[#allocation5_spill] sm:$0xff] %v1278_v4  ;;  %v1285_v5 = vld [vmem:[%s2603_s0 + $0x50] sm:$0xff]  ;;  %v1290_v6 = vld [vmem:[%s2603_s0 + $0x40] sm:$0xff] }
   0x4   :  { %2685 = vst [vmem:[#allocation6_spill] sm:$0xff] %v1285_v5  ;;  %2686 = vst [vmem:[#allocation7_spill] sm:$0xff] %v1290_v6  ;;  %v1297_v7 = vld [vmem:[%s2603_s0 + $0x70] sm:$0xff]  ;;  %v1302_v8 = vld [vmem:[%s2603_s0 + $0x60] sm:$0xff] }
   0x5   :  { %2687 = vst [vmem:[#allocation8_spill] sm:$0xff] %v1297_v7  ;;  %2688 = vst [vmem:[#allocation9_spill] sm:$0xff] %v1309_v9  ;;  %v1314_v10 = vld [vmem:[%s2603_s0 + $0x8] sm:$0xff]  ;;  %v1321_v11 = vld [vmem:[%s2603_s0 + $0x38] sm:$0xff] }
   0x6   :  { %84 = vrot.lane.b32.xlu1 %v1273_v3, %s1238_s13  ;;  %2689 = vst [vmem:[#allocation10_spill] sm:$0xff] %v1314_v10  ;;  %2690 = vst [vmem:[#allocation11_spill] sm:$0xff] %v1321_v11  ;;  %v1326_v12 = vld [vmem:[%s2603_s0 + $0x28] sm:$0xff]  ;;  %v1333_v13 = vld [vmem:[%s2603_s0 + $0x58] sm:$0xff] }
   0x7   :  { %80 = vrot.lane.b32.xlu0 %v1278_v4, %s1238_s13  ;;  %2691 = vst [vmem:[#allocation12_spill] sm:$0xff] %v1326_v12  ;;  %2692 = vst [vmem:[#allocation13_spill] sm:$0xff] %v1333_v13  ;;  %v1338_v14 = vld [vmem:[%s2603_s0 + $0x48] sm:$0xff]  ;;  %v1345_v15 = vld [vmem:[%s2603_s0 + $0x78] sm:$0xff] }
   0x8   :  { %2693 = vst [vmem:[#allocation14_spill] sm:$0xff] %v1338_v14  ;;  %2694 = vst [vmem:[#allocation15_spill] sm:$0xff] %v1345_v15  ;;  %v1350_v16 = vld [vmem:[%s2603_s0 + $0x68] sm:$0xff]  ;;  %v208_v18 = vld [vmem:[%s2604_s1] sm:$0xff] }
   0x9   :  { %2695 = vst [vmem:[#allocation16_spill] sm:$0xff] %v1350_v16  ;;  %v209_v17 = vld [vmem:[%s2604_s1 + $0x8] sm:$0xff]  ;;  %v210_v19 = vld [vmem:[%s2604_s1 + $0x10] sm:$0xff]  ;;  %v211_v20 = vld [vmem:[%s2604_s1 + $0x18] sm:$0xff] }
   0xa   :  { %88 = vrot.lane.b32.xlu1 %v1285_v5, %s1238_s13  ;;  %v212_v21 = vld [vmem:[%s2604_s1 + $0x20] sm:$0xff]  ;;  %v213_v22 = vld [vmem:[%s2604_s1 + $0x28] sm:$0xff]  ;;  %v214_v23 = vld [vmem:[%s2604_s1 + $0x30] sm:$0xff] }
   0xb   :  { %86 = vrot.lane.b32.xlu0 %v1290_v6, %s1238_s13  ;;  %v215_v24 = vld [vmem:[%s2604_s1 + $0x38] sm:$0xff]  ;;  %v1141_v25 = vld [vmem:[%s2604_s1 + $0x40] sm:$0xff]  ;;  %v1142_v26 = vld [vmem:[%s2604_s1 + $0x48] sm:$0xff] }
   0xc   :  { %v1143_v27 = vld [vmem:[%s2604_s1 + $0x50] sm:$0xff]  ;;  %v1144_v28 = vld [vmem:[%s2604_s1 + $0x58] sm:$0xff]  ;;  %v1145_v29 = vld [vmem:[%s2604_s1 + $0x60] sm:$0xff] }
   0xd   :  { %v1146_v30 = vld [vmem:[%s2604_s1 + $0x68] sm:$0xff]  ;;  %v1147_v31 = vld [vmem:[%s2604_s1 + $0x70] sm:$0xff]  ;;  %v1148_v32 = vld [vmem:[%s2604_s1 + $0x78] sm:$0xff] }
   0xe   :  { %92 = vrot.lane.b32.xlu1 %v1297_v7, %s1238_s13  ;;  %v1149_v33 = vld [vmem:[%s2604_s1 + $0x80] sm:$0xff]  ;;  %v1150_v34 = vld [vmem:[%s2604_s1 + $0x88] sm:$0xff]  ;;  %v1151_v35 = vld [vmem:[%s2604_s1 + $0x90] sm:$0xff] }
   0xf   :  { %90 = vrot.lane.b32.xlu0 %v1302_v8, %s1238_s13  ;;  %v1152_v36 = vld [vmem:[%s2604_s1 + $0x98] sm:$0xff]  ;;  %v1153_v37 = vld [vmem:[%s2604_s1 + $0xa0] sm:$0xff]  ;;  %v1154_v38 = vld [vmem:[%s2604_s1 + $0xa8] sm:$0xff] }
  0x10   :  { %v1155_v39 = vld [vmem:[%s2604_s1 + $0xb0] sm:$0xff]  ;;  %v1156_v40 = vld [vmem:[%s2604_s1 + $0xb8] sm:$0xff]  ;;  %v1157_v41 = vld [vmem:[%s2604_s1 + $0xc0] sm:$0xff] }
  0x11   :  { %v1158_v42 = vld [vmem:[%s2604_s1 + $0xc8] sm:$0xff]  ;;  %v1159_v43 = vld [vmem:[%s2604_s1 + $0xd0] sm:$0xff]  ;;  %v1160_v44 = vld [vmem:[%s2604_s1 + $0xd8] sm:$0xff] }
  0x12   :  { %96 = vrot.lane.b32.xlu1 %v1309_v9, %s1238_s13  ;;  %v1161_v47 = vld [vmem:[%s2604_s1 + $0xe0] sm:$0xff]  ;;  %v1162_v48 = vld [vmem:[%s2604_s1 + $0xe8] sm:$0xff]  ;;  %v1163_v51 = vld [vmem:[%s2604_s1 + $0xf0] sm:$0xff] }
  0x13   :  { %94 = vrot.lane.b32.xlu0 %v1314_v10, %s1238_s13  ;;  %v1164_v52 = vld [vmem:[%s2604_s1 + $0xf8] sm:$0xff]  ;;  %v1165_v55 = vld [vmem:[%s2604_s1 + $0x100] sm:$0xff]  ;;  %v1166_v56 = vld [vmem:[%s2604_s1 + $0x108] sm:$0xff] }
  0x14   :  { %v1167_v59 = vld [vmem:[%s2604_s1 + $0x110] sm:$0xff]  ;;  %v1168_v62 = vld [vmem:[%s2604_s1 + $0x118] sm:$0xff]  ;;  %v1169_v63 = vld [vmem:[%s2604_s1 + $0x120] sm:$0xff] }
  0x16   :  { %100 = vrot.lane.b32.xlu1 %v1321_v11, %s1238_s13 }
  0x17   :  { %98 = vrot.lane.b32.xlu0 %v1326_v12, %s1238_s13 }
  0x1a   :  { %104 = vrot.lane.b32.xlu1 %v1333_v13, %s1238_s13 }
  0x1b   :  { %102 = vrot.lane.b32.xlu0 %v1338_v14, %s1238_s13 }
  0x1e   :  { %108 = vrot.lane.b32.xlu1 %v1345_v15, %s1238_s13 }
  0x1f   :  { %106 = vrot.lane.b32.xlu0 %v1350_v16, %s1238_s13 }
  0x22   :  { %145 = vrot.lane.b32.xlu1 %v1278_v4, %s1239_s15 }
  0x23   :  { %143 = vrot.lane.b32.xlu0 %v1266_v1, %s1239_s15 }
  0x26   :  { %149 = vrot.lane.b32.xlu1 %v1273_v3, %s1239_s15 }
  0x27   :  { %147 = vrot.lane.b32.xlu0 %v1261_v0, %s1239_s15 }
  0x2a   :  { %153 = vrot.lane.b32.xlu1 %v1285_v5, %s1239_s15 }
  0x2b   :  { %151 = vrot.lane.b32.xlu0 %v1290_v6, %s1239_s15 }
  0x2e   :  { %157 = vrot.lane.b32.xlu1 %v1297_v7, %s1239_s15 }
  0x2f   :  { %155 = vrot.lane.b32.xlu0 %v1302_v8, %s1239_s15 }
  0x32   :  { %161 = vrot.lane.b32.xlu1 %v1309_v9, %s1239_s15 }
  0x33   :  { %159 = vrot.lane.b32.xlu0 %v1314_v10, %s1239_s15 }
  0x36   :  { %165 = vrot.lane.b32.xlu1 %v1321_v11, %s1239_s15 }
  0x37   :  { %163 = vrot.lane.b32.xlu0 %v1326_v12, %s1239_s15 }
  0x3a   :  { %169 = vrot.lane.b32.xlu1 %v1333_v13, %s1239_s15 }
  0x3b   :  { %167 = vrot.lane.b32.xlu0 %v1338_v14, %s1239_s15  ;;  %v2627_v14 = vmov 0.0  }
  0x3e   :  { %173 = vrot.lane.b32.xlu1 %v1345_v15, %s1239_s15 }
  0x3f   :  { %171 = vrot.lane.b32.xlu0 %v1350_v16, %s1239_s15 }
  0x42   :  { %223 = vperm.xlu1 %1220, %v209_v17  }
  0x43   :  { %218 = vperm.xlu0 %1219, %v208_v18   ;;  %v1170_v18 = vld [vmem:[%s2604_s1 + $0x128] sm:$0xff] }
  0x46   :  { %228 = vperm.xlu1 %1220, %v210_v19   ;;  %v1171_v19 = vld [vmem:[%s2604_s1 + $0x130] sm:$0xff] }
  0x47   :  { %233 = vperm.xlu0 %1219, %v211_v20  }
  0x4a   :  { %238 = vperm.xlu1 %1220, %v212_v21  }
  0x4b   :  { %243 = vperm.xlu0 %1219, %v213_v22   ;;  %v1172_v22 = vld [vmem:[%s2604_s1 + $0x138] sm:$0xff] }
  0x4e   :  { %248 = vperm.xlu1 %1220, %v214_v23   ;;  %v1173_v23 = vld [vmem:[%s2604_s1 + $0x140] sm:$0xff] }
  0x4f   :  { %253 = vperm.xlu0 %1219, %v215_v24  }
  0x52   :  { %283 = vperm.xlu1 %1220, %v1141_v25  }
  0x53   :  { %288 = vperm.xlu0 %1219, %v1142_v26   ;;  %v1174_v26 = vld [vmem:[%s2604_s1 + $0x148] sm:$0xff] }
  0x56   :  { %293 = vperm.xlu1 %1220, %v1143_v27   ;;  %v1175_v27 = vld [vmem:[%s2604_s1 + $0x150] sm:$0xff] }
  0x57   :  { %298 = vperm.xlu0 %1219, %v1144_v28  }
  0x5a   :  { %303 = vperm.xlu1 %1220, %v1145_v29  }
  0x5b   :  { %308 = vperm.xlu0 %1219, %v1146_v30   ;;  %v1176_v30 = vld [vmem:[%s2604_s1 + $0x158] sm:$0xff] }
  0x5e   :  { %313 = vperm.xlu1 %1220, %v1147_v31   ;;  %v1177_v31 = vld [vmem:[%s2604_s1 + $0x160] sm:$0xff] }
  0x5f   :  { %318 = vperm.xlu0 %1219, %v1148_v32  }
  0x62   :  { %364 = vperm.xlu1 %1220, %v1149_v33  }
  0x63   :  { %369 = vperm.xlu0 %1219, %v1150_v34   ;;  %v1178_v34 = vld [vmem:[%s2604_s1 + $0x168] sm:$0xff] }
  0x66   :  { %374 = vperm.xlu1 %1220, %v1151_v35   ;;  %v1179_v35 = vld [vmem:[%s2604_s1 + $0x170] sm:$0xff] }
  0x67   :  { %379 = vperm.xlu0 %1219, %v1152_v36  }
  0x6a   :  { %384 = vperm.xlu1 %1220, %v1153_v37  }
  0x6b   :  { %389 = vperm.xlu0 %1219, %v1154_v38   ;;  %v1180_v38 = vld [vmem:[%s2604_s1 + $0x178] sm:$0xff] }
  0x6e   :  { %394 = vperm.xlu1 %1220, %v1155_v39   ;;  %v1181_v39 = vld [vmem:[%s2604_s1 + $0x180] sm:$0xff] }
  0x6f   :  { %399 = vperm.xlu0 %1219, %v1156_v40   ;;  %v1182_v40 = vld [vmem:[%s2604_s1 + $0x188] sm:$0xff] }
  0x72   :  { %445 = vperm.xlu1 %1220, %v1157_v41  }
  0x73   :  { %450 = vperm.xlu0 %1219, %v1158_v42  }
  0x74   :  { %v1454_v45 = vpop.permute.xlu1 %82 }
  0x75   :  { %2696 = vst [vmem:[#allocation17_spill] sm:$0xff] %v1454_v45  ;;  %v1456_v46 = vpop.permute.xlu0 %78 }
  0x76   :  { %455 = vperm.xlu1 %1220, %v1159_v43   ;;  %v1183_v43 = vld [vmem:[%s2604_s1 + $0x190] sm:$0xff] }
  0x77   :  { %460 = vperm.xlu0 %1219, %v1160_v44   ;;  %v1184_v44 = vld [vmem:[%s2604_s1 + $0x198] sm:$0xff] }
  0x78   :  { %v1464_v49 = vpop.permute.xlu1 %84 }
  0x79   :  { %v1466_v50 = vpop.permute.xlu0 %80 }
  0x7a   :  { %465 = vperm.xlu1 %1220, %v1161_v47  }
  0x7b   :  { %470 = vperm.xlu0 %1219, %v1162_v48  }
  0x7c   :  { %v1474_v53 = vpop.permute.xlu1 %88 }
  0x7d   :  { %2697 = vst [vmem:[#allocation18_spill] sm:$0xff] %v1474_v53  ;;  %v1476_v54 = vpop.permute.xlu0 %86 }
  0x7e   :  { %2698 = vst [vmem:[#allocation19_spill] sm:$0xff] %v1476_v54  ;;  %475 = vperm.xlu1 %1220, %v1163_v51   ;;  %v1185_v51 = vld [vmem:[%s2604_s1 + $0x1a0] sm:$0xff] }
  0x7f   :  { %480 = vperm.xlu0 %1219, %v1164_v52   ;;  %v1186_v52 = vld [vmem:[%s2604_s1 + $0x1a8] sm:$0xff] }
  0x80   :  { %v1484_v57 = vpop.permute.xlu1 %92 }
  0x81   :  { %2699 = vst [vmem:[#allocation20_spill] sm:$0xff] %v1484_v57  ;;  %v1486_v58 = vpop.permute.xlu0 %90 }
  0x82   :  { %510 = vperm.xlu1 %1220, %v1165_v55   ;;  %v1187_v55 = vld [vmem:[%s2604_s1 + $0x1b0] sm:$0xff] }
  0x83   :  { %515 = vperm.xlu0 %1219, %v1166_v56   ;;  %v1188_v56 = vld [vmem:[%s2604_s1 + $0x1b8] sm:$0xff] }
  0x84   :  { %v1491_v60 = vpop.permute.xlu1 %96 }
  0x85   :  { %v1493_v61 = vpop.permute.xlu0 %94 }
  0x86   :  { %520 = vperm.xlu1 %1220, %v1167_v59  }
  0x87   :  { %525 = vperm.xlu0 %1219, %v1168_v62  }
  0x88   :  { %v1501_v2 = vpop.permute.xlu1 %100 }
  0x89   :  { %v1503_v17 = vpop.permute.xlu0 %98 }
  0x8a   :  { %530 = vperm.xlu1 %1220, %v1169_v63   ;;  %v1189_v63 = vld [vmem:[%s2604_s1 + $0x1c0] sm:$0xff] }
  0x8b   :  { %535 = vperm.xlu0 %1219, %v1170_v18   ;;  %v1190_v18 = vld [vmem:[%s2604_s1 + $0x1c8] sm:$0xff] }
  0x8c   :  { %v1511_v20 = vpop.permute.xlu1 %104 }
  0x8d   :  { %2700 = vst [vmem:[#allocation21_spill] sm:$0xff] %v1511_v20  ;;  %v1513_v21 = vpop.permute.xlu0 %102 }
  0x8e   :  { %2701 = vst [vmem:[#allocation22_spill] sm:$0xff] %v1513_v21  ;;  %540 = vperm.xlu1 %1220, %v1171_v19  }
  0x8f   :  { %545 = vperm.xlu0 %1219, %v1172_v22  }
  0x90   :  { %v1521_v24 = vpop.permute.xlu1 %108 }
  0x91   :  { %2702 = vst [vmem:[#allocation23_spill] sm:$0xff] %v1521_v24  ;;  %v1523_v25 = vpop.permute.xlu0 %106 }
  0x92   :  { %591 = vperm.xlu1 %1220, %v1173_v23   ;;  %v1191_v23 = vld [vmem:[%s2604_s1 + $0x1d0] sm:$0xff] }
  0x93   :  { %596 = vperm.xlu0 %1219, %v1174_v26   ;;  %v1192_v26 = vld [vmem:[%s2604_s1 + $0x1d8] sm:$0xff] }
  0x94   :  { %v1531_v28 = vpop.permute.xlu1 %145 }
  0x95   :  { %v1533_v29 = vpop.permute.xlu0 %143 }
  0x96   :  { %601 = vperm.xlu1 %1220, %v1175_v27   ;;  %v1193_v27 = vld [vmem:[%s2604_s1 + $0x1e0] sm:$0xff] }
  0x97   :  { %606 = vperm.xlu0 %1219, %v1176_v30   ;;  %v1194_v30 = vld [vmem:[%s2604_s1 + $0x1e8] sm:$0xff] }
  0x98   :  { %v1541_v32 = vpop.permute.xlu1 %149 }
  0x99   :  { %v1543_v33 = vpop.permute.xlu0 %147 }
  0x9a   :  { %611 = vperm.xlu1 %1220, %v1177_v31  }
  0x9b   :  { %616 = vperm.xlu0 %1219, %v1178_v34  }
  0x9c   :  { %v1551_v36 = vpop.permute.xlu1 %153 }
  0x9d   :  { %v1553_v37 = vpop.permute.xlu0 %151 }
  0x9e   :  { %621 = vperm.xlu1 %1220, %v1179_v35   ;;  %v1195_v35 = vld [vmem:[%s2604_s1 + $0x1f0] sm:$0xff] }
  0x9f   :  { %626 = vperm.xlu0 %1219, %v1180_v38   ;;  %v1196_v38 = vld [vmem:[%s2604_s1 + $0x1f8] sm:$0xff] }
  0xa0   :  { %v1564_v41 = vpop.permute.xlu1 %157 }
  0xa1   :  { %v1566_v42 = vpop.permute.xlu0 %155 }
  0xa2   :  { %672 = vperm.xlu1 %1220, %v1181_v39  }
  0xa3   :  { %677 = vperm.xlu0 %1219, %v1182_v40  }
  0xa4   :  { %v1574_v47 = vpop.permute.xlu1 %161 }
  0xa5   :  { %v1576_v48 = vpop.permute.xlu0 %159 }
  0xa6   :  { %682 = vperm.xlu1 %1220, %v1183_v43   ;;  %v1197_v43 = vld [vmem:[%s2604_s1 + $0x200] sm:$0xff] }
  0xa7   :  { %687 = vperm.xlu0 %1219, %v1184_v44   ;;  %v1198_v44 = vld [vmem:[%s2604_s1 + $0x208] sm:$0xff] }
  0xa8   :  { %v1590_v59 = vpop.permute.xlu1 %165 }
  0xa9   :  { %v1592_v62 = vpop.permute.xlu0 %163 }
  0xaa   :  { %692 = vperm.xlu1 %1220, %v1185_v51  }
  0xab   :  { %697 = vperm.xlu0 %1219, %v1186_v52  }
  0xac   :  { %v1600_v19 = vpop.permute.xlu1 %169 }
  0xad   :  { %v1602_v22 = vpop.permute.xlu0 %167 }
  0xae   :  { %702 = vperm.xlu1 %1220, %v1187_v55   ;;  %v27_v55 = vlaneseq }
  0xaf   :  { %707 = vperm.xlu0 %1219, %v1188_v56   ;;  %v1199_v56 = vld [vmem:[%s2604_s1 + $0x210] sm:$0xff] }
  0xb0   :  { %v1616_v31 = vpop.permute.xlu1 %173 }
  0xb1   :  { %v1618_v34 = vpop.permute.xlu0 %171 }
  0xb2   :  { %737 = vperm.xlu1 %1220, %v1189_v63   ;;  %v1200_v63 = vld [vmem:[%s2604_s1 + $0x218] sm:$0xff] }
  0xb3   :  { %742 = vperm.xlu0 %1219, %v1190_v18  }
  0xb6   :  { %747 = vperm.xlu1 %1220, %v1191_v23  }
  0xb7   :  { %752 = vperm.xlu0 %1219, %v1192_v26   ;;  %v1650_v26 = vand.u32 127, %v27_v55  ;;  %v1204_v55 = vld [vmem:[%s2604_s1 + $0x238] sm:$0xff] }
  0xb9   :  { %2706 = vst [vmem:[#allocation27_spill] sm:$0xff] %v1650_v26  ;;  %v34_v15 = vand.u32 15, %v1650_v26  ;;  %vm110_vm1 = vcmp.lt.s32.totalorder %v1650_v26, 1  ;;  %vm175_vm5 = vcmp.lt.s32.totalorder %v1650_v26, 127 }
  0xba   :  { %757 = vperm.xlu1 %1220, %v1193_v27   ;;  %v1201_v27 = vld [vmem:[%s2604_s1 + $0x220] sm:$0xff]  ;;  %v112_v11 = vsel %vm110_vm1, %v1466_v50, %v1491_v60  ;;  %v1712_v10 = vsel %vm110_vm1, %v1456_v46, %v1493_v61  ;;  %v122_v9 = vsel %vm110_vm1, %v1501_v2, %v1464_v49 }
  0xbb   :  { %762 = vperm.xlu0 %1219, %v1194_v30   ;;  %v1202_v30 = vld [vmem:[%s2604_s1 + $0x228] sm:$0xff]  ;;  %vm54_vm0 = vcmp.gt.s32.totalorder %v34_v15, 0  ;;  %vm60_vm3 = vcmp.lt.s32.totalorder %v34_v15, 15 }
  0xbc   :  { %v1683_v13 = vsel %vm54_vm0, 1.0, %v2627_v14 }
  0xbd   :  { %v1626_v39 = vpop.permute.xlu1 %223 }
  0xbe   :  { %2703 = vst [vmem:[#allocation24_spill] sm:$0xff] %v1626_v39  ;;  %v1628_v40 = vpop.permute.xlu0 %218  ;;  %767 = vperm.xlu1 %1220, %v1195_v35  }
  0xbf   :  { %2704 = vst [vmem:[#allocation25_spill] sm:$0xff] %v1628_v40  ;;  %772 = vperm.xlu0 %1219, %v1196_v38  }
  0xc1   :  { %v1636_v51 = vpop.permute.xlu1 %228 }
  0xc2   :  { %2705 = vst [vmem:[#allocation26_spill] sm:$0xff] %v1636_v51  ;;  %v1638_v52 = vpop.permute.xlu0 %233  ;;  %818 = vperm.xlu1 %1220, %v1197_v43   ;;  %v1663_v43 = vadd.s32 128, %v1650_v26 }
  0xc3   :  { %823 = vperm.xlu0 %1219, %v1198_v44   ;;  %v1203_v44 = vld [vmem:[%s2604_s1 + $0x230] sm:$0xff] }
  0xc4   :  { %2709 = vst [vmem:[#allocation30_spill] sm:$0xff] %v1663_v43 }
  0xc5   :  { %v1646_v18 = vpop.permute.xlu1 %238 }
  0xc6   :  { %v1648_v23 = vpop.permute.xlu0 %243  ;;  %828 = vperm.xlu1 %1220, %v1199_v56  }
  0xc7   :  { %833 = vperm.xlu0 %1219, %v1200_v63  }
  0xc9   :  { %v1658_v35 = vpop.permute.xlu1 %248 }
  0xca   :  { %2707 = vst [vmem:[#allocation28_spill] sm:$0xff] %v1658_v35  ;;  %v1660_v38 = vpop.permute.xlu0 %253  ;;  %838 = vperm.xlu1 %1220, %v1201_v27   ;;  %v41_v27 = vand.u32 15, %v1663_v43 }
  0xcb   :  { %2708 = vst [vmem:[#allocation29_spill] sm:$0xff] %v1660_v38  ;;  %843 = vperm.xlu0 %1219, %v1202_v30  }
  0xcc   :  { %vm55_vm2 = vcmp.gt.s32.totalorder %v41_v27, 0  ;;  %vm61_vm4 = vcmp.lt.s32.totalorder %v41_v27, 15  ;;  %v1701_v27 = vsel %vm60_vm3, 1.0, %v2627_v14 }
  0xcd   :  { %v1671_v56 = vpop.permute.xlu1 %283  ;;  %v1698_v15 = vsel %vm55_vm2, 1.0, %v2627_v14  ;;  %v1719_v38 = vsel %vm61_vm4, 1.0, %v2627_v14 }
  0xce   :  { %2710 = vst [vmem:[#allocation31_spill] sm:$0xff] %v1671_v56  ;;  %v1673_v63 = vpop.permute.xlu0 %288  ;;  %848 = vperm.xlu1 %1220, %v1203_v44   ;;  %v120_v44 = vsel %vm110_vm1, %v1491_v60, %v1466_v50  ;;  %2711 = vst [vmem:[#allocation32_spill] sm:$0xff] %v1719_v38  ;;  %v124_v50 = vsel %vm110_vm1, %v1511_v20, %v1474_v53  ;;  %v177_v60 = vsel %vm175_vm5, %v1531_v28, %v1574_v47 }
  0xcf   :  { %853 = vperm.xlu0 %1219, %v1204_v55   ;;  %v119_v55 = vsel %vm110_vm1, %v1493_v61, %v1456_v46  ;;  %v1722_v35 = vmul.f32 %v1683_v13, %v120_v44  ;;  %v121_v46 = vsel %vm110_vm1, %v1503_v17, %v1454_v45  ;;  %v176_v61 = vsel %vm175_vm5, %v1533_v29, %v1576_v48 }
  0xd0   :  { %v1725_v7 = vmul.f32 %v1683_v13, %v119_v55  ;;  %v321_v44 = vmul.f32 %v1671_v56, %v1266_v1  ;;  %v323_v55 = vmul.f32 %v1673_v63, %v1278_v4  ;;  %v1752_v53 = vmul.f32 %v1698_v15, %v112_v11 }
  0xd1   :  { %v1677_v16 = vpop.permute.xlu1 %293  ;;  %2712 = vst [vmem:[#allocation33_spill] sm:$0xff] %v1722_v35  ;;  %v1758_v20 = vsel %vm110_vm1, %v1464_v49, %v1501_v2  ;;  %v1761_v45 = vmul.f32 %v1683_v13, %v122_v9  ;;  %v123_v4 = vsel %vm110_vm1, %v1513_v21, %v1476_v54  ;;  %v1768_v1 = vmul.f32 %v1683_v13, %v121_v46 }
  0xd2   :  { %v1679_v30 = vpop.permute.xlu0 %298  ;;  %2713 = vst [vmem:[#allocation34_spill] sm:$0xff] %v1725_v7  ;;  %2714 = vst [vmem:[#allocation35_spill] sm:$0xff] %v1752_v53  ;;  %v1771_v11 = vmul.f32 %v1683_v13, %v124_v50  ;;  %v258_v53 = vmul.f32 %v1626_v39, %v1722_v35  ;;  %v256_v49 = vmul.f32 %v1628_v40, %v1725_v7 }
  0xd3   :  { %2715 = vst [vmem:[#allocation36_spill] sm:$0xff] %v1761_v45  ;;  %2716 = vst [vmem:[#allocation37_spill] sm:$0xff] %v1768_v1  ;;  %v1778_v9 = vmul.f32 %v1701_v27, %v177_v60  ;;  %v1781_v2 = vmul.f32 %v1701_v27, %v176_v61  ;;  %v179_v46 = vsel %vm175_vm5, %v1541_v32, %v1590_v59 }
  0xd4   :  { %2717 = vst [vmem:[#allocation38_spill] sm:$0xff] %v1771_v11  ;;  %v178_v50 = vsel %vm175_vm5, %v1543_v33, %v1592_v62  ;;  %v1792_v35 = vmul.f32 %v1683_v13, %v123_v4  ;;  %v126_v60 = vsel %vm110_vm1, %v1521_v24, %v1484_v57  ;;  %v337_v61 = vadd.f32 %v321_v44, %v256_v49 }
  0xd5   :  { %v1693_v43 = vpop.permute.xlu1 %303  ;;  %2718 = vst [vmem:[#allocation39_spill] sm:$0xff] %v1778_v9  ;;  %2719 = vst [vmem:[#allocation40_spill] sm:$0xff] %v1781_v2  ;;  %v339_v7 = vadd.f32 %v323_v55, %v258_v53  ;;  %v325_v40 = vmul.f32 %v1677_v16, %v1261_v0  ;;  %v327_v39 = vmul.f32 %v1679_v30, %v1273_v3 }
  0xd6   :  { %v1695_v12 = vpop.permute.xlu0 %308  ;;  %2720 = vst [vmem:[#allocation41_spill] sm:$0xff] %v1792_v35  ;;  %v1811_v57 = vmul.f32 %v1701_v27, %v179_v46  ;;  %v1814_v53 = vmul.f32 %v1701_v27, %v178_v50  ;;  %v181_v44 = vsel %vm175_vm5, %v1551_v36, %v1600_v19  ;;  %v180_v55 = vsel %vm175_vm5, %v1553_v37, %v1602_v22 }
  0xd7   :  { %v260_v49 = vmul.f32 %v1636_v51, %v1768_v1  ;;  %v262_v46 = vmul.f32 %v1638_v52, %v1761_v45  ;;  %v1829_v50 = vmul.f32 %v1683_v13, %v126_v60  ;;  %v125_v3 = vsel %vm110_vm1, %v1523_v25, %v1486_v58  ;;  %v2726_v45 = vld [vmem:[#allocation8_spill] sm:$0xff] }
  0xd8   :  { %2721 = vst [vmem:[#allocation42_spill] sm:$0xff] %v1811_v57  ;;  %2722 = vst [vmem:[#allocation43_spill] sm:$0xff] %v1814_v53  ;;  %v329_v0 = vmul.f32 %v1693_v43, %v1290_v6  ;;  %v331_v24 = vmul.f32 %v1695_v12, %v1285_v5  ;;  %v1852_v5 = vmul.f32 %v1701_v27, %v180_v55 }
  0xd9   :  { %v1747_v14 = vpop.permute.xlu1 %313  ;;  %2723 = vst [vmem:[#allocation44_spill] sm:$0xff] %v1829_v50  ;;  %v264_v6 = vmul.f32 %v1646_v18, %v1792_v35 }
  0xda   :  { %v1749_v38 = vpop.permute.xlu0 %318  ;;  %2725 = vst [vmem:[#allocation46_spill] sm:$0xff] %v1852_v5  ;;  %v333_v35 = vmul.f32 %v1747_v14, %v1302_v8 }
  0xdd   :  { %v1798_v54 = vpop.permute.xlu1 %364 }
  0xde   :  { %v1800_v21 = vpop.permute.xlu0 %369  ;;  %v402_v4 = vmul.f32 %v1798_v54, %v1781_v2 }
  0xdf   :  { %v404_v56 = vmul.f32 %v1800_v21, %v1778_v9 }
  0xe0   :  { %v418_v9 = vadd.f32 %v402_v4, %v337_v61  ;;  %v341_v61 = vadd.f32 %v325_v40, %v260_v49  ;;  %v1849_v4 = vmul.f32 %v1701_v27, %v181_v44  ;;  %v183_v40 = vsel %vm175_vm5, %v1564_v41, %v1616_v31 }
  0xe1   :  { %v420_v2 = vadd.f32 %v404_v56, %v339_v7  ;;  %v1839_v1 = vpop.permute.xlu1 %374  ;;  %v343_v7 = vadd.f32 %v327_v39, %v262_v46  ;;  %v266_v39 = vmul.f32 %v1648_v23, %v1771_v11  ;;  %v1868_v49 = vmul.f32 %v1683_v13, %v125_v3 }
  0xe2   :  { %v1841_v51 = vpop.permute.xlu0 %379  ;;  %v406_v56 = vmul.f32 %v1839_v1, %v1814_v53  ;;  %2724 = vst [vmem:[#allocation45_spill] sm:$0xff] %v1849_v4  ;;  %888 = vrot.lane.b32.xlu1 %v418_v9, %s1241_s19  ;;  %v185_v9 = vsel %vm175_vm5, %v1574_v47, %v1531_v28  ;;  %v345_v46 = vadd.f32 %v329_v0, %v264_v6  ;;  %v2729_v47 = vld [vmem:[#allocation28_spill] sm:$0xff] }
  0xe3   :  { %v408_v60 = vmul.f32 %v1841_v51, %v1811_v57  ;;  %890 = vrot.lane.b32.xlu0 %v420_v2, %s1241_s19  ;;  %v182_v2 = vsel %vm175_vm5, %v1566_v42, %v1618_v34  ;;  %v347_v57 = vadd.f32 %v331_v24, %v266_v39  ;;  %v1889_v0 = vmul.f32 %v1698_v15, %v1712_v10 }
  0xe4   :  { %v422_v44 = vadd.f32 %v406_v56, %v341_v61  ;;  %v335_v61 = vmul.f32 %v1749_v38, %v2726_v45  ;;  %v184_v6 = vsel %vm175_vm5, %v1576_v48, %v1533_v29  ;;  %v1896_v24 = vmul.f32 %v1701_v27, %v183_v40  ;;  %v2730_v56 = vld [vmem:[#allocation29_spill] sm:$0xff] }
  0xe5   :  { %v424_v55 = vadd.f32 %v408_v60, %v343_v7  ;;  %v1874_v53 = vpop.permute.xlu1 %384  ;;  %v1899_v28 = vmul.f32 %v1701_v27, %v182_v2  ;;  %v268_v7 = vmul.f32 %v2729_v47, %v1868_v49  ;;  %v270_v10 = vmul.f32 %v2730_v56, %v1829_v50  ;;  %v2731_v29 = vld [vmem:[#allocation17_spill] sm:$0xff]  ;;  %v2732_v27 = vld [vmem:[#allocation32_spill] sm:$0xff]  ;;  %v2741_v50 = vld [vmem:[#allocation22_spill] sm:$0xff] }
  0xe6   :  { %v1876_v11 = vpop.permute.xlu0 %389  ;;  %v410_v3 = vmul.f32 %v1874_v53, %v1852_v5  ;;  %2727 = vst [vmem:[#allocation47_spill] sm:$0xff] %v1896_v24  ;;  %892 = vrot.lane.b32.xlu1 %v422_v44, %s1241_s19  ;;  %v113_v48 = vsel %vm110_vm1, %v2731_v29, %v1503_v17  ;;  %v1915_v40 = vmul.f32 %v2732_v27, %v185_v9  ;;  %v2733_v2 = vld [vmem:[#allocation9_spill] sm:$0xff]  ;;  %v2734_v9 = vld [vmem:[#allocation10_spill] sm:$0xff] }
  0xe7   :  { %v412_v13 = vmul.f32 %v1876_v11, %v1849_v4  ;;  %894 = vrot.lane.b32.xlu0 %v424_v55, %s1241_s19  ;;  %2728 = vst [vmem:[#allocation48_spill] sm:$0xff] %v1899_v28  ;;  %v1908_v55 = vmul.f32 %v1698_v15, %v1758_v20  ;;  %v324_v44 = vmul.f32 %v1673_v63, %v2733_v2 }
  0xe8   :  { %v426_v60 = vadd.f32 %v410_v3, %v345_v46  ;;  %v351_v46 = vadd.f32 %v335_v61, %v270_v10  ;;  %v1929_v17 = vmul.f32 %v2732_v27, %v184_v6  ;;  %v187_v63 = vsel %vm175_vm5, %v1590_v59, %v1541_v32  ;;  %v2735_v61 = vld [vmem:[#allocation31_spill] sm:$0xff]  ;;  %v2737_v10 = vld [vmem:[#allocation24_spill] sm:$0xff]  ;;  %v2738_v59 = vld [vmem:[#allocation21_spill] sm:$0xff] }
  0xe9   :  { %v428_v39 = vadd.f32 %v412_v13, %v347_v57  ;;  %v1919_v4 = vpop.permute.xlu1 %394  ;;  %v349_v57 = vadd.f32 %v333_v35, %v268_v7  ;;  %v186_v35 = vsel %vm175_vm5, %v1592_v62, %v1543_v33  ;;  %v322_v13 = vmul.f32 %v2735_v61, %v2734_v9  ;;  %v2736_v7 = vld [vmem:[#allocation35_spill] sm:$0xff]  ;;  %v2740_v62 = vld [vmem:[#allocation25_spill] sm:$0xff] }
  0xea   :  { %v1921_v5 = vpop.permute.xlu0 %399  ;;  %v414_v20 = vmul.f32 %v1919_v4, %v1899_v28  ;;  %896 = vrot.lane.b32.xlu1 %v426_v60, %s1241_s19  ;;  %v405_v6 = vmul.f32 %v1800_v21, %v1915_v40  ;;  %v1947_v32 = vmul.f32 %v1698_v15, %v113_v48  ;;  %v2739_v28 = vld [vmem:[#allocation18_spill] sm:$0xff]  ;;  %v257_v61 = vmul.f32 %v2740_v62, %v1889_v0  ;;  %v2742_v21 = vld [vmem:[#allocation19_spill] sm:$0xff]  ;;  %v2744_v62 = vld [vmem:[#allocation12_spill] sm:$0xff] }
  0xeb   :  { %v416_v3 = vmul.f32 %v1921_v5, %v1896_v24  ;;  %898 = vrot.lane.b32.xlu0 %v428_v39, %s1241_s19  ;;  %v259_v39 = vmul.f32 %v2737_v10, %v2736_v7  ;;  %v116_v33 = vsel %vm110_vm1, %v2739_v28, %v2738_v59  ;;  %v403_v60 = vmul.f32 %v1798_v54, %v1929_v17 }
  0xec   :  { %v430_v29 = vadd.f32 %v414_v20, %v349_v57  ;;  %v115_v57 = vsel %vm110_vm1, %v2742_v21, %v2741_v50  ;;  %v1962_v48 = vmul.f32 %v2732_v27, %v187_v63  ;;  %v2743_v20 = vld [vmem:[#allocation11_spill] sm:$0xff]  ;;  %v189_v54 = vsel %vm175_vm5, %v1600_v19, %v1551_v36  ;;  %v2745_v36 = vld [vmem:[#allocation26_spill] sm:$0xff] }
  0xed   :  { %v432_v24 = vadd.f32 %v416_v3, %v351_v46  ;;  %v446_v10 = vpop.permute.xlu1 %445  ;;  %v340_v46 = vadd.f32 %v324_v44, %v259_v39  ;;  %v328_v28 = vmul.f32 %v1679_v30, %v2743_v20  ;;  %v1968_v3 = vmul.f32 %v2732_v27, %v186_v35 }
  0xee   :  { %v451_v45 = vpop.permute.xlu0 %450  ;;  %v338_v59 = vadd.f32 %v322_v13, %v257_v61  ;;  %v326_v50 = vmul.f32 %v1677_v16, %v2744_v62  ;;  %900 = vrot.lane.b32.xlu1 %v430_v29, %s1241_s19  ;;  %v188_v30 = vsel %vm175_vm5, %v1602_v22, %v1553_v37  ;;  %v409_v63 = vmul.f32 %v1841_v51, %v1962_v48 }
  0xef   :  { %902 = vrot.lane.b32.xlu0 %v432_v24, %s1241_s19  ;;  %v263_v24 = vmul.f32 %v1638_v52, %v1908_v55  ;;  %v421_v44 = vadd.f32 %v405_v6, %v340_v46  ;;  %v261_v19 = vmul.f32 %v2745_v36, %v1947_v32  ;;  %v407_v16 = vmul.f32 %v1839_v1, %v1968_v3  ;;  %v2746_v52 = vld [vmem:[#allocation13_spill] sm:$0xff] }
  0xf0   :  { %v419_v35 = vadd.f32 %v403_v60, %v338_v59  ;;  %v1992_v29 = vmul.f32 %v1698_v15, %v116_v33  ;;  %v1995_v37 = vmul.f32 %v2732_v27, %v189_v54  ;;  %v332_v51 = vmul.f32 %v1695_v12, %v2746_v52  ;;  %v2747_v60 = vld [vmem:[#allocation14_spill] sm:$0xff] }
  0xf1   :  { %v456_v13 = vpop.permute.xlu1 %455  ;;  %v344_v22 = vadd.f32 %v328_v28, %v263_v24  ;;  %v2001_v6 = vmul.f32 %v1698_v15, %v115_v57  ;;  %v2004_v1 = vmul.f32 %v2732_v27, %v188_v30  ;;  %v342_v61 = vadd.f32 %v326_v50, %v261_v19 }
  0xf2   :  { %v1989_v39 = vpop.permute.xlu0 %460  ;;  %v330_v33 = vmul.f32 %v1693_v43, %v2747_v60  ;;  %904 = vrot.lane.b32.xlu1 %v419_v35, %s1241_s19  ;;  %v267_v21 = vmul.f32 %v1648_v23, %v1992_v29  ;;  %v413_v12 = vmul.f32 %v1876_v11, %v1995_v37  ;;  %v117_v19 = vsel %vm110_vm1, %v1486_v58, %v1523_v25 }
  0xf3   :  { %906 = vrot.lane.b32.xlu0 %v421_v44, %s1241_s19  ;;  %v425_v46 = vadd.f32 %v409_v63, %v344_v22  ;;  %v265_v57 = vmul.f32 %v1646_v18, %v2001_v6  ;;  %v423_v28 = vadd.f32 %v407_v16, %v342_v61  ;;  %v411_v54 = vmul.f32 %v1874_v53, %v2004_v1  ;;  %v1206_v18 = vld [vmem:[%s2604_s1 + $0x248] sm:$0xff]  ;;  %v2749_v63 = vld [vmem:[#allocation20_spill] sm:$0xff]  ;;  %v1205_v22 = vld [vmem:[%s2604_s1 + $0x240] sm:$0xff] }
  0xf4   :  { %v348_v43 = vadd.f32 %v332_v51, %v267_v21  ;;  %v2748_v53 = vld [vmem:[#allocation23_spill] sm:$0xff]  ;;  %v191_v35 = vsel %vm175_vm5, %v1616_v31, %v1564_v41  ;;  %v190_v16 = vsel %vm175_vm5, %v1618_v34, %v1566_v42  ;;  %v2750_v51 = vld [vmem:[#allocation34_spill] sm:$0xff]  ;;  %v2751_v21 = vld [vmem:[#allocation33_spill] sm:$0xff]  ;;  %v486_v25 = vmul.f32 %v451_v45, %v2736_v7 }
  0xf5   :  { %v2017_v59 = vpop.permute.xlu1 %465  ;;  %v346_v30 = vadd.f32 %v330_v33, %v265_v57  ;;  %v118_v36 = vsel %vm110_vm1, %v2749_v63, %v2748_v53  ;;  %v483_v61 = vmul.f32 %v446_v10, %v2750_v51  ;;  %v484_v33 = vmul.f32 %v446_v10, %v1889_v0  ;;  %v2752_v41 = vld [vmem:[#allocation3_spill] sm:$0xff]  ;;  %v1208_v10 = vld [vmem:[%s2604_s1 + $0x258] sm:$0xff] }
  0xf6   :  { %v2019_v50 = vpop.permute.xlu0 %470  ;;  %908 = vrot.lane.b32.xlu1 %v423_v28, %s1241_s19  ;;  %v429_v23 = vadd.f32 %v413_v12, %v348_v43  ;;  %v485_v58 = vmul.f32 %v451_v45, %v2751_v21  ;;  %v2753_v28 = vld [vmem:[#allocation5_spill] sm:$0xff] }
  0xf7   :  { %910 = vrot.lane.b32.xlu0 %v425_v46, %s1241_s19  ;;  %v427_v24 = vadd.f32 %v411_v54, %v346_v30  ;;  %v2755_v63 = vld [vmem:[#allocation37_spill] sm:$0xff] }
  0xf9   :  { %v2023_v11 = vpop.permute.xlu1 %475 }
  0xfa   :  { %v2025_v44 = vpop.permute.xlu0 %480  ;;  %912 = vrot.lane.b32.xlu1 %v427_v24, %s1241_s19  ;;  %v2080_v24 = vmul.f32 %v2732_v27, %v191_v35  ;;  %v2758_v35 = vld [vmem:[#allocation4_spill] sm:$0xff] }
  0xfb   :  { %914 = vrot.lane.b32.xlu0 %v429_v23, %s1241_s19  ;;  %v2077_v23 = vmul.f32 %v1698_v15, %v117_v19  ;;  %v490_v19 = vmul.f32 %v1989_v39, %v1908_v55 }
  0xfd   :  { %v511_v46 = vpop.permute.xlu1 %510 }
  0xfe   :  { %v516_v12 = vpop.permute.xlu0 %515  ;;  %v548_v31 = vmul.f32 %v511_v46, %v2752_v41  ;;  %v549_v57 = vmul.f32 %v511_v46, %v2734_v9  ;;  %1029 = vperm.xlu1 %1220, %v1205_v22   ;;  %v1207_v9 = vld [vmem:[%s2604_s1 + $0x250] sm:$0xff]  ;;  %v487_v22 = vmul.f32 %v456_v13, %v2755_v63 }
  0xff   :  { %v550_v42 = vmul.f32 %v516_v12, %v2753_v28  ;;  %v551_v34 = vmul.f32 %v516_v12, %v2733_v2  ;;  %1034 = vperm.xlu0 %1219, %v1206_v18   ;;  %v2074_v2 = vmul.f32 %v1698_v15, %v118_v36  ;;  %v2083_v18 = vmul.f32 %v2732_v27, %v190_v16  ;;  %v2757_v46 = vld [vmem:[#allocation36_spill] sm:$0xff]  ;;  %v2760_v28 = vld [vmem:[#allocation15_spill] sm:$0xff] }
 0x100   :  { %v2062_v54 = vadd.f32 %v548_v31, %v483_v61  ;;  %v2064_v43 = vadd.f32 %v549_v57, %v484_v33  ;;  %v488_v61 = vmul.f32 %v456_v13, %v1947_v32  ;;  %v2756_v33 = vld [vmem:[#allocation2_spill] sm:$0xff]  ;;  %v489_v15 = vmul.f32 %v1989_v39, %v2757_v46  ;;  %v1210_v13 = vld [vmem:[%s2604_s1 + $0x268] sm:$0xff]  ;;  %v2759_v12 = vld [vmem:[#allocation16_spill] sm:$0xff] }
 0x101   :  { %v2066_v45 = vadd.f32 %v550_v42, %v485_v58  ;;  %v2068_v30 = vadd.f32 %v551_v34, %v486_v25  ;;  %2754 = vst [vmem:[#allocation28_spill] sm:$0xff] %v2074_v2  ;;  %v521_v53 = vpop.permute.xlu1 %520  ;;  %v334_v41 = vmul.f32 %v1747_v14, %v2759_v12  ;;  %v1209_v39 = vld [vmem:[%s2604_s1 + $0x260] sm:$0xff]  ;;  %v336_v42 = vmul.f32 %v1749_v38, %v2760_v28  ;;  %v2761_v14 = vld [vmem:[#allocation41_spill] sm:$0xff] }
 0x102   :  { %v552_v58 = vmul.f32 %v521_v53, %v2756_v33  ;;  %v553_v25 = vmul.f32 %v521_v53, %v2744_v62  ;;  %v526_v36 = vpop.permute.xlu0 %525  ;;  %1039 = vperm.xlu1 %1220, %v1207_v9   ;;  %v269_v62 = vmul.f32 %v2729_v47, %v2077_v23  ;;  %v491_v9 = vmul.f32 %v2017_v59, %v2761_v14 }
 0x103   :  { %1044 = vperm.xlu0 %1219, %v1208_v10   ;;  %v554_v27 = vmul.f32 %v526_v36, %v2758_v35  ;;  %v555_v16 = vmul.f32 %v526_v36, %v2743_v20  ;;  %v271_v20 = vmul.f32 %v2730_v56, %v2074_v2  ;;  %v492_v53 = vmul.f32 %v2017_v59, %v2001_v6  ;;  %v2763_v56 = vld [vmem:[#allocation38_spill] sm:$0xff]  ;;  %v1212_v59 = vld [vmem:[%s2604_s1 + $0x278] sm:$0xff] }
 0x104   :  { %v2102_v31 = vadd.f32 %v552_v58, %v487_v22  ;;  %v2104_v57 = vadd.f32 %v553_v25, %v488_v61  ;;  %v2762_v22 = vld [vmem:[#allocation7_spill] sm:$0xff]  ;;  %v493_v38 = vmul.f32 %v2019_v50, %v2763_v56  ;;  %v494_v25 = vmul.f32 %v2019_v50, %v1992_v29  ;;  %v2764_v36 = vld [vmem:[#allocation6_spill] sm:$0xff] }
 0x105   :  { %v2113_v34 = vadd.f32 %v554_v27, %v489_v15  ;;  %v2115_v47 = vadd.f32 %v555_v16, %v490_v19  ;;  %v531_v10 = vpop.permute.xlu1 %530  ;;  %v350_v35 = vadd.f32 %v334_v41, %v269_v62  ;;  %v352_v50 = vadd.f32 %v336_v42, %v271_v20  ;;  %v2766_v42 = vld [vmem:[#allocation8_spill] sm:$0xff] }
 0x106   :  { %v556_v61 = vmul.f32 %v531_v10, %v2762_v22  ;;  %v557_v33 = vmul.f32 %v531_v10, %v2747_v60  ;;  %v536_v58 = vpop.permute.xlu0 %535  ;;  %1049 = vperm.xlu1 %1220, %v1209_v39   ;;  %v417_v60 = vmul.f32 %v1921_v5, %v2080_v24  ;;  %v415_v10 = vmul.f32 %v1919_v4, %v2083_v18 }
 0x107   :  { %1054 = vperm.xlu0 %1219, %v1210_v13   ;;  %v558_v15 = vmul.f32 %v536_v58, %v2764_v36  ;;  %v559_v19 = vmul.f32 %v536_v58, %v2746_v52  ;;  %v1211_v13 = vld [vmem:[%s2604_s1 + $0x270] sm:$0xff]  ;;  %v495_v58 = vmul.f32 %v2023_v11, %v1868_v49  ;;  %v496_v62 = vmul.f32 %v2023_v11, %v2077_v23 }
 0x108   :  { %v572_v27 = vadd.f32 %v556_v61, %v491_v9  ;;  %v573_v16 = vadd.f32 %v557_v33, %v492_v53  ;;  %v2765_v53 = vld [vmem:[#allocation44_spill] sm:$0xff]  ;;  %v498_v4 = vmul.f32 %v2025_v44, %v2074_v2  ;;  %v431_v36 = vadd.f32 %v415_v10, %v350_v35  ;;  %v2771_v10 = vld [vmem:[#allocation43_spill] sm:$0xff] }
 0x109   :  { %v574_v52 = vadd.f32 %v558_v15, %v493_v38  ;;  %v575_v39 = vadd.f32 %v559_v19, %v494_v25  ;;  %v541_v22 = vpop.permute.xlu1 %540  ;;  %v497_v20 = vmul.f32 %v2025_v44, %v2765_v53  ;;  %v433_v38 = vadd.f32 %v417_v60, %v352_v50  ;;  %v2767_v19 = vld [vmem:[#allocation40_spill] sm:$0xff]  ;;  %v2768_v44 = vld [vmem:[#allocation39_spill] sm:$0xff] }
 0x10a   :  { %v560_v5 = vmul.f32 %v541_v22, %v1302_v8  ;;  %v561_v41 = vmul.f32 %v541_v22, %v2759_v12  ;;  %v546_v9 = vpop.permute.xlu0 %545  ;;  %1059 = vperm.xlu1 %1220, %v1211_v13  }
 0x10b   :  { %1064 = vperm.xlu0 %1219, %v1212_v59   ;;  %v562_v61 = vmul.f32 %v546_v9, %v2766_v42  ;;  %v563_v33 = vmul.f32 %v546_v9, %v2760_v28 }
 0x10c   :  { %v576_v25 = vadd.f32 %v560_v5, %v495_v58  ;;  %v577_v11 = vadd.f32 %v561_v41, %v496_v62  ;;  %v2772_v5 = vld [vmem:[#allocation42_spill] sm:$0xff] }
 0x10d   :  { %v578_v8 = vadd.f32 %v562_v61, %v497_v20  ;;  %v579_v15 = vadd.f32 %v563_v33, %v498_v4  ;;  %v592_v12 = vpop.permute.xlu1 %591  ;;  %v2777_v20 = vld [vmem:[#allocation46_spill] sm:$0xff] }
 0x10e   :  { %v629_v59 = vmul.f32 %v592_v12, %v2767_v19  ;;  %v630_v22 = vmul.f32 %v592_v12, %v1929_v17  ;;  %v597_v26 = vpop.permute.xlu0 %596  ;;  %916 = vrot.lane.b32.xlu1 %v431_v36, %s1241_s19 }
 0x10f   :  { %918 = vrot.lane.b32.xlu0 %v433_v38, %s1241_s19  ;;  %v631_v2 = vmul.f32 %v597_v26, %v2768_v44  ;;  %v632_v42 = vmul.f32 %v597_v26, %v1915_v40  ;;  %v2778_v38 = vld [vmem:[#allocation45_spill] sm:$0xff] }
 0x110   :  { %v2158_v28 = vadd.f32 %v629_v59, %v2062_v54  ;;  %v2161_v35 = vadd.f32 %v630_v22, %v2064_v43 }
 0x111   :  { %v602_v60 = vpop.permute.xlu1 %601  ;;  %v2164_v13 = vadd.f32 %v631_v2, %v2066_v45  ;;  %v2167_v50 = vadd.f32 %v632_v42, %v2068_v30 }
 0x112   :  { %2769 = vst [vmem:[#allocation29_spill] sm:$0xff] %v2158_v28  ;;  %v633_v58 = vmul.f32 %v602_v60, %v2771_v10  ;;  %v634_v62 = vmul.f32 %v602_v60, %v1968_v3  ;;  %v607_v26 = vpop.permute.xlu0 %606 }
 0x113   :  { %2770 = vst [vmem:[#allocation17_spill] sm:$0xff] %v2164_v13  ;;  %v635_v41 = vmul.f32 %v607_v26, %v2772_v5  ;;  %v636_v54 = vmul.f32 %v607_v26, %v1962_v48 }
 0x114   :  { %v2174_v9 = vadd.f32 %v633_v58, %v2102_v31  ;;  %v2177_v43 = vadd.f32 %v634_v62, %v2104_v57  ;;  %v2784_v62 = vld [vmem:[#allocation47_spill] sm:$0xff] }
 0x115   :  { %v612_v45 = vpop.permute.xlu1 %611  ;;  %v2180_v2 = vadd.f32 %v635_v41, %v2113_v34  ;;  %v2183_v30 = vadd.f32 %v636_v54, %v2115_v47  ;;  %v2783_v47 = vld [vmem:[#allocation48_spill] sm:$0xff] }
 0x116   :  { %2773 = vst [vmem:[#allocation32_spill] sm:$0xff] %v2174_v9  ;;  %2774 = vst [vmem:[#allocation9_spill] sm:$0xff] %v2177_v43  ;;  %v637_v4 = vmul.f32 %v612_v45, %v2777_v20  ;;  %v638_v61 = vmul.f32 %v612_v45, %v2004_v1  ;;  %v617_v33 = vpop.permute.xlu0 %616 }
 0x117   :  { %2775 = vst [vmem:[#allocation10_spill] sm:$0xff] %v2180_v2  ;;  %2776 = vst [vmem:[#allocation31_spill] sm:$0xff] %v2183_v30  ;;  %v639_v36 = vmul.f32 %v617_v33, %v2778_v38  ;;  %v640_v31 = vmul.f32 %v617_v33, %v1995_v37 }
 0x118   :  { %v2189_v12 = vadd.f32 %v637_v4, %v572_v27  ;;  %v2191_v57 = vadd.f32 %v638_v61, %v573_v16 }
 0x119   :  { %v622_v59 = vpop.permute.xlu1 %621  ;;  %v2193_v22 = vadd.f32 %v639_v36, %v574_v52  ;;  %v2195_v34 = vadd.f32 %v640_v31, %v575_v39 }
 0x11a   :  { %2779 = vst [vmem:[#allocation35_spill] sm:$0xff] %v2189_v12  ;;  %2780 = vst [vmem:[#allocation24_spill] sm:$0xff] %v2191_v57  ;;  %v641_v42 = vmul.f32 %v622_v59, %v2783_v47  ;;  %v642_v60 = vmul.f32 %v622_v59, %v2083_v18  ;;  %v627_v58 = vpop.permute.xlu0 %626 }
 0x11b   :  { %2781 = vst [vmem:[#allocation21_spill] sm:$0xff] %v2193_v22  ;;  %2782 = vst [vmem:[#allocation18_spill] sm:$0xff] %v2195_v34  ;;  %v643_v26 = vmul.f32 %v627_v58, %v2784_v62  ;;  %v644_v41 = vmul.f32 %v627_v58, %v2080_v24 }
 0x11c   :  { %v2201_v54 = vadd.f32 %v641_v42, %v576_v25  ;;  %v2203_v27 = vadd.f32 %v642_v60, %v577_v11 }
 0x11d   :  { %v2205_v16 = vpop.permute.xlu1 %672  ;;  %v2207_v45 = vadd.f32 %v643_v26, %v578_v8  ;;  %v2209_v52 = vadd.f32 %v644_v41, %v579_v15  ;;  %v1221_v26 = vld [vmem:[%s2603_s0] sm:$0xff] }
 0x11e   :  { %2785 = vst [vmem:[#allocation25_spill] sm:$0xff] %v2201_v54  ;;  %2786 = vst [vmem:[#allocation22_spill] sm:$0xff] %v2203_v27  ;;  %v2211_v39 = vpop.permute.xlu0 %677  ;;  %v1222_v54 = vld [vmem:[%s2603_s0 + $0x10] sm:$0xff]  ;;  %v710_v22 = vmul.f32 %v2205_v16, %v2750_v51 }
 0x11f   :  { %2787 = vst [vmem:[#allocation19_spill] sm:$0xff] %v2207_v45  ;;  %2788 = vst [vmem:[#allocation11_spill] sm:$0xff] %v2209_v52  ;;  %v712_v9 = vmul.f32 %v2211_v39, %v2751_v21 }
 0x121   :  { %v2213_v4 = vpop.permute.xlu1 %682 }
 0x122   :  { %v2215_v61 = vpop.permute.xlu0 %687 }
 0x123   :  { %v716_v34 = vmul.f32 %v2215_v61, %v2757_v46  ;;  %v1226_v46 = vld [vmem:[%s2603_s0 + $0x50] sm:$0xff] }
 0x125   :  { %v2217_v33 = vpop.permute.xlu1 %692 }
 0x126   :  { %v2219_v36 = vpop.permute.xlu0 %697 }
 0x129   :  { %v2221_v25 = vpop.permute.xlu1 %702 }
 0x12a   :  { %v2223_v11 = vpop.permute.xlu0 %707 }
 0x12d   :  { %v2225_v31 = vpop.permute.xlu1 %737 }
 0x12e   :  { %v2227_v8 = vpop.permute.xlu0 %742  ;;  %v775_v41 = vmul.f32 %v1221_v26, %v2225_v31  ;;  %v1223_v26 = vld [vmem:[%s2603_s0 + $0x20] sm:$0xff] }
 0x12f   :  { %v777_v12 = vmul.f32 %v1222_v54, %v2227_v8  ;;  %v1224_v54 = vld [vmem:[%s2603_s0 + $0x30] sm:$0xff] }
 0x130   :  { %v791_v13 = vadd.f32 %v775_v41, %v710_v22  ;;  %v714_v22 = vmul.f32 %v2213_v4, %v2755_v63 }
 0x131   :  { %v2229_v15 = vpop.permute.xlu1 %747  ;;  %v793_v57 = vadd.f32 %v777_v12, %v712_v9  ;;  %v1225_v9 = vld [vmem:[%s2603_s0 + $0x40] sm:$0xff] }
 0x132   :  { %v2231_v59 = vpop.permute.xlu0 %752  ;;  %v779_v28 = vmul.f32 %v1223_v26, %v2229_v15 }
 0x133   :  { %v781_v51 = vmul.f32 %v1224_v54, %v2231_v59 }
 0x135   :  { %v2233_v42 = vpop.permute.xlu1 %757  ;;  %v797_v63 = vadd.f32 %v781_v51, %v716_v34  ;;  %v1227_v51 = vld [vmem:[%s2603_s0 + $0x60] sm:$0xff] }
 0x136   :  { %v2235_v60 = vpop.permute.xlu0 %762  ;;  %v783_v12 = vmul.f32 %v1225_v9, %v2233_v42  ;;  %v722_v9 = vmul.f32 %v2221_v25, %v1868_v49  ;;  %v1230_v49 = vld [vmem:[%s2603_s0 + $0x18] sm:$0xff] }
 0x139   :  { %v2237_v58 = vpop.permute.xlu1 %767 }
 0x13a   :  { %v2243_v45 = vpop.permute.xlu0 %772 }
 0x13d   :  { %v819_v2 = vpop.permute.xlu1 %818 }
 0x13e   :  { %v856_v27 = vmul.f32 %v819_v2, %v2767_v19  ;;  %v824_v52 = vpop.permute.xlu0 %823  ;;  %v795_v19 = vadd.f32 %v779_v28, %v714_v22  ;;  %v787_v22 = vmul.f32 %v1227_v51, %v2237_v58 }
 0x13f   :  { %v858_v21 = vmul.f32 %v824_v52, %v2768_v44  ;;  %v785_v44 = vmul.f32 %v1226_v46, %v2235_v60  ;;  %v1229_v46 = vld [vmem:[%s2603_s0 + $0x8] sm:$0xff]  ;;  %v859_v51 = vmul.f32 %v824_v52, %v1915_v40  ;;  %v715_v40 = vmul.f32 %v2213_v4, %v1947_v32  ;;  %v1234_v32 = vld [vmem:[%s2603_s0 + $0x58] sm:$0xff] }
 0x140   :  { %v872_v41 = vadd.f32 %v856_v27, %v791_v13  ;;  %v718_v13 = vmul.f32 %v2217_v33, %v2761_v14  ;;  %v1228_v14 = vld [vmem:[%s2603_s0 + $0x70] sm:$0xff]  ;;  %v721_v4 = vmul.f32 %v2219_v36, %v1992_v29 }
 0x141   :  { %v874_v26 = vadd.f32 %v858_v21, %v793_v57  ;;  %v829_v43 = vpop.permute.xlu1 %828 }
 0x142   :  { %v860_v54 = vmul.f32 %v829_v43, %v2771_v10  ;;  %v834_v30 = vpop.permute.xlu0 %833  ;;  %953 = vrot.lane.b32.xlu1 %v872_v41, %s1242_s17  ;;  %v720_v10 = vmul.f32 %v2219_v36, %v2763_v56  ;;  %v799_v34 = vadd.f32 %v783_v12, %v718_v13  ;;  %v789_v56 = vmul.f32 %v1228_v14, %v2243_v45  ;;  %v1233_v14 = vld [vmem:[%s2603_s0 + $0x48] sm:$0xff] }
 0x143   :  { %v862_v28 = vmul.f32 %v834_v30, %v2772_v5  ;;  %955 = vrot.lane.b32.xlu0 %v874_v26, %s1242_s17 }
 0x144   :  { %v876_v57 = vadd.f32 %v860_v54, %v795_v19  ;;  %v801_v26 = vadd.f32 %v785_v44, %v720_v10  ;;  %v776_v44 = vmul.f32 %v1229_v46, %v2225_v31  ;;  %v711_v31 = vmul.f32 %v2205_v16, %v1889_v0  ;;  %v1232_v0 = vld [vmem:[%s2603_s0 + $0x38] sm:$0xff] }
 0x145   :  { %v878_v27 = vadd.f32 %v862_v28, %v797_v63  ;;  %v839_v21 = vpop.permute.xlu1 %838  ;;  %v803_v28 = vadd.f32 %v787_v22, %v722_v9  ;;  %v717_v16 = vmul.f32 %v2215_v61, %v1908_v55  ;;  %v719_v55 = vmul.f32 %v2217_v33, %v2001_v6  ;;  %v1236_v33 = vld [vmem:[%s2603_s0 + $0x78] sm:$0xff] }
 0x146   :  { %v864_v5 = vmul.f32 %v839_v21, %v2777_v20  ;;  %v844_v41 = vpop.permute.xlu0 %843  ;;  %957 = vrot.lane.b32.xlu1 %v876_v57, %s1242_s17  ;;  %v724_v20 = vmul.f32 %v2223_v11, %v2765_v53  ;;  %v778_v53 = vmul.f32 %v1230_v49, %v2227_v8  ;;  %v1231_v8 = vld [vmem:[%s2603_s0 + $0x28] sm:$0xff]  ;;  %v790_v29 = vmul.f32 %v1236_v33, %v2243_v45 }
 0x147   :  { %v866_v19 = vmul.f32 %v844_v41, %v2778_v38  ;;  %959 = vrot.lane.b32.xlu0 %v878_v27, %s1242_s17  ;;  %v857_v27 = vmul.f32 %v819_v2, %v1929_v17  ;;  %v782_v17 = vmul.f32 %v1232_v0, %v2231_v59  ;;  %v861_v2 = vmul.f32 %v829_v43, %v1968_v3 }
 0x148   :  { %v880_v12 = vadd.f32 %v864_v5, %v799_v34  ;;  %v805_v57 = vadd.f32 %v789_v56, %v724_v20  ;;  %v713_v34 = vmul.f32 %v2211_v39, %v2736_v7  ;;  %v792_v5 = vadd.f32 %v776_v44, %v711_v31 }
 0x149   :  { %v882_v54 = vadd.f32 %v866_v19, %v801_v26  ;;  %v849_v63 = vpop.permute.xlu1 %848  ;;  %v863_v39 = vmul.f32 %v834_v30, %v1962_v48  ;;  %v784_v59 = vmul.f32 %v1233_v14, %v2233_v42  ;;  %v798_v56 = vadd.f32 %v782_v17, %v717_v16 }
 0x14a   :  { %v868_v38 = vmul.f32 %v849_v63, %v2783_v47  ;;  %v854_v13 = vpop.permute.xlu0 %853  ;;  %961 = vrot.lane.b32.xlu1 %v880_v12, %s1242_s17  ;;  %v794_v26 = vadd.f32 %v778_v53, %v713_v34  ;;  %v873_v7 = vadd.f32 %v857_v27, %v792_v5  ;;  %v786_v3 = vmul.f32 %v1234_v32, %v2235_v60  ;;  %v1235_v60 = vld [vmem:[%s2603_s0 + $0x68] sm:$0xff] }
 0x14b   :  { %v870_v10 = vmul.f32 %v854_v13, %v2784_v62  ;;  %963 = vrot.lane.b32.xlu0 %v882_v54, %s1242_s17  ;;  %v780_v62 = vmul.f32 %v1231_v8, %v2229_v15  ;;  %v865_v43 = vmul.f32 %v839_v21, %v2004_v1  ;;  %v879_v61 = vadd.f32 %v863_v39, %v798_v56  ;;  %v2793_v39 = vld [vmem:[#allocation18_spill] sm:$0xff]  ;;  %v2794_v56 = vld [vmem:[#allocation24_spill] sm:$0xff] }
 0x14c   :  { %v884_v47 = vadd.f32 %v868_v38, %v803_v28  ;;  %v875_v52 = vadd.f32 %v859_v51, %v794_v26  ;;  %v867_v42 = vmul.f32 %v844_v41, %v1995_v37  ;;  %v800_v9 = vadd.f32 %v784_v59, %v719_v55  ;;  %v2791_v26 = vld [vmem:[#allocation31_spill] sm:$0xff] }
 0x14d   :  { %v886_v22 = vadd.f32 %v870_v10, %v805_v57  ;;  %v796_v15 = vadd.f32 %v780_v62, %v715_v40  ;;  %v788_v6 = vmul.f32 %v1235_v60, %v2237_v58  ;;  %v802_v1 = vadd.f32 %v786_v3, %v721_v4  ;;  %v2789_v58 = vld [vmem:[#allocation28_spill] sm:$0xff]  ;;  %v2790_v10 = vld [vmem:[#allocation27_spill] sm:$0xff]  ;;  %v2792_v40 = vld [vmem:[#allocation9_spill] sm:$0xff] }
 0x14e   :  { %965 = vrot.lane.b32.xlu1 %v884_v47, %s1242_s17  ;;  %v723_v37 = vmul.f32 %v2221_v25, %v2077_v23  ;;  %v881_v36 = vadd.f32 %v865_v43, %v800_v9  ;;  %v869_v21 = vmul.f32 %v849_v63, %v2083_v18  ;;  %v725_v12 = vmul.f32 %v2223_v11, %v2789_v58  ;;  %v2796_v60 = vld [vmem:[#allocation22_spill] sm:$0xff] }
 0x14f   :  { %967 = vrot.lane.b32.xlu0 %v886_v22, %s1242_s17  ;;  %v877_v48 = vadd.f32 %v861_v2, %v796_v15  ;;  %v883_v20 = vadd.f32 %v867_v42, %v802_v1  ;;  %v871_v54 = vmul.f32 %v854_v13, %v2080_v24  ;;  %vm920_vm6 = vcmp.lt.s32.totalorder %v2790_v10, 16 }
 0x150   :  { %v804_v44 = vadd.f32 %v788_v6, %v723_v37  ;;  %v806_v45 = vadd.f32 %v790_v29, %v725_v12  ;;  %vm66_vm7 = vcmp.ge.s32.totalorder %v2790_v10, 16  ;;  %vm985_vm9 = vcmp.lt.s32.totalorder %v2790_v10, 112 }
 0x152   :  { %969 = vrot.lane.b32.xlu1 %v873_v7, %s1242_s17  ;;  %v885_v23 = vadd.f32 %v869_v21, %v804_v44  ;;  %v887_v25 = vadd.f32 %v871_v54, %v806_v45  ;;  %v2797_v45 = vmov 0.0  }
 0x153   :  { %971 = vrot.lane.b32.xlu0 %v875_v52, %s1242_s17 }
 0x154   :  { %v2351_v19 = vpop.permute.xlu1 %888 }
 0x155   :  { %v2346_v30 = vpop.permute.xlu0 %890 }
 0x156   :  { %973 = vrot.lane.b32.xlu1 %v877_v48, %s1242_s17 }
 0x157   :  { %975 = vrot.lane.b32.xlu0 %v879_v61, %s1242_s17  ;;  %v2795_v61 = vld [vmem:[#allocation11_spill] sm:$0xff] }
 0x158   :  { %v2371_v46 = vpop.permute.xlu1 %892 }
 0x159   :  { %v2366_v41 = vpop.permute.xlu0 %894 }
 0x15a   :  { %977 = vrot.lane.b32.xlu1 %v881_v36, %s1242_s17 }
 0x15b   :  { %979 = vrot.lane.b32.xlu0 %v883_v20, %s1242_s17 }
 0x15c   :  { %v2377_v18 = vpop.permute.xlu1 %896 }
 0x15d   :  { %v2375_v28 = vpop.permute.xlu0 %898 }
 0x15e   :  { %981 = vrot.lane.b32.xlu1 %v885_v23, %s1242_s17  ;;  %v2446_v23 = vsel %vm66_vm7, 1.0, %v2797_v45 }
 0x15f   :  { %983 = vrot.lane.b32.xlu0 %v887_v25, %s1242_s17 }
 0x160   :  { %v2383_v24 = vpop.permute.xlu1 %900 }
 0x161   :  { %v2381_v11 = vpop.permute.xlu0 %902 }
 0x164   :  { %v905_v38 = vpop.permute.xlu1 %904 }
 0x165   :  { %v907_v63 = vpop.permute.xlu0 %906  ;;  %v921_v22 = vsel %vm920_vm6, %v2351_v19, %v905_v38  ;;  %v929_v25 = vsel %vm920_vm6, %v905_v38, %v2351_v19  ;;  %v2800_v38 = vld [vmem:[#allocation17_spill] sm:$0xff] }
 0x166   :  { %v922_v34 = vsel %vm920_vm6, %v2346_v30, %v907_v63 }
 0x168   :  { %v909_v49 = vpop.permute.xlu1 %908 }
 0x169   :  { %v911_v13 = vpop.permute.xlu0 %910 }
 0x16c   :  { %v913_v57 = vpop.permute.xlu1 %912 }
 0x16d   :  { %v915_v53 = vpop.permute.xlu0 %914  ;;  %v925_v3 = vsel %vm920_vm6, %v2377_v18, %v913_v57 }
 0x16e   :  { %v926_v59 = vsel %vm920_vm6, %v2375_v28, %v915_v53  ;;  %v934_v19 = vsel %vm920_vm6, %v915_v53, %v2375_v28 }
 0x179   :  { %v1030_v47 = vpop.permute.xlu1 %1029 }
 0x17a   :  { %v1035_v31 = vpop.permute.xlu0 %1034  ;;  %v1068_v51 = vadd.f32 %v1030_v47, %v2161_v35  ;;  %v923_v35 = vsel %vm920_vm6, %v2371_v46, %v909_v49 }
 0x17b   :  { %v1070_v27 = vadd.f32 %v1035_v31, %v2167_v50  ;;  %v924_v50 = vsel %vm920_vm6, %v2366_v41, %v911_v13 }
 0x17c   :  { %v2396_v8 = vadd.f32 %v1068_v51, %v921_v22  ;;  %v2798_v51 = vld [vmem:[#allocation29_spill] sm:$0xff] }
 0x17d   :  { %v2394_v5 = vadd.f32 %v1070_v27, %v922_v34  ;;  %v1040_v17 = vpop.permute.xlu1 %1039  ;;  %v930_v27 = vsel %vm920_vm6, %v907_v63, %v2346_v30  ;;  %v932_v34 = vsel %vm920_vm6, %v911_v13, %v2366_v41  ;;  %v1067_v22 = vadd.f32 %v1030_v47, %v2798_v51 }
 0x17e   :  { %v1045_v62 = vpop.permute.xlu0 %1044  ;;  %v1072_v7 = vadd.f32 %v1040_v17, %v2792_v40  ;;  %v1069_v30 = vadd.f32 %v1035_v31, %v2800_v38  ;;  %v937_v41 = vmul.f32 %v2446_v23, %v929_v25  ;;  %v933_v13 = vsel %vm920_vm6, %v913_v57, %v2377_v18  ;;  %v2804_v25 = vld [vmem:[#allocation35_spill] sm:$0xff] }
 0x17f   :  { %v1074_v0 = vadd.f32 %v1045_v62, %v2791_v26  ;;  %v939_v47 = vmul.f32 %v2446_v23, %v930_v27  ;;  %v947_v31 = vmul.f32 %v2446_v23, %v934_v19  ;;  %v945_v18 = vmul.f32 %v2446_v23, %v933_v13  ;;  %v2805_v19 = vld [vmem:[#allocation25_spill] sm:$0xff] }
 0x180   :  { %v2408_v16 = vadd.f32 %v1072_v7, %v923_v35  ;;  %v1083_v7 = vadd.f32 %v1067_v22, %v937_v41  ;;  %v2802_v35 = vld [vmem:[#allocation32_spill] sm:$0xff] }
 0x181   :  { %v2406_v2 = vadd.f32 %v1074_v0, %v924_v50  ;;  %v1050_v14 = vpop.permute.xlu1 %1049  ;;  %v2799_v0 = vld [vmem:[#allocation30_spill] sm:$0xff]  ;;  %v931_v50 = vsel %vm920_vm6, %v909_v49, %v2371_v46  ;;  %v943_v46 = vmul.f32 %v2446_v23, %v932_v34  ;;  %v1085_v57 = vadd.f32 %v1069_v30, %v939_v47 }
 0x182   :  { %v1055_v52 = vpop.permute.xlu0 %1054  ;;  %v1076_v32 = vadd.f32 %v1050_v14, %v2794_v56  ;;  %vm73_vm8 = vcmp.lt.s32.totalorder %v2799_v0, 240  ;;  %v2801_v49 = vld [vmem:[#allocation10_spill] sm:$0xff]  ;;  %v941_v53 = vmul.f32 %v2446_v23, %v931_v50  ;;  %v1075_v27 = vadd.f32 %v1050_v14, %v2804_v25 }
 0x183   :  { %v1078_v15 = vadd.f32 %v1055_v52, %v2793_v39  ;;  %v1073_v40 = vadd.f32 %v1045_v62, %v2801_v49  ;;  %v2479_v28 = vsel %vm73_vm8, 1.0, %v2797_v45  ;;  %v1071_v39 = vadd.f32 %v1040_v17, %v2802_v35 }
 0x184   :  { %v2420_v48 = vadd.f32 %v1076_v32, %v925_v3  ;;  %v1091_v50 = vadd.f32 %v1075_v27, %v945_v18 }
 0x185   :  { %v2418_v55 = vadd.f32 %v1078_v15, %v926_v59  ;;  %v2424_v4 = vpop.permute.xlu1 %1059  ;;  %v1087_v45 = vadd.f32 %v1071_v39, %v941_v53  ;;  %v2806_v53 = vld [vmem:[#allocation19_spill] sm:$0xff] }
 0x186   :  { %v2422_v43 = vpop.permute.xlu0 %1064  ;;  %v1080_v6 = vadd.f32 %v2424_v4, %v2796_v60  ;;  %v2803_v60 = vld [vmem:[#allocation21_spill] sm:$0xff]  ;;  %v1079_v38 = vadd.f32 %v2424_v4, %v2805_v19 }
 0x187   :  { %v1082_v42 = vadd.f32 %v2422_v43, %v2795_v61 }
 0x189   :  { %v917_v33 = vpop.permute.xlu1 %916 }
 0x18a   :  { %v919_v9 = vpop.permute.xlu0 %918  ;;  %v927_v37 = vsel %vm920_vm6, %v2383_v24, %v917_v33 }
 0x18b   :  { %v928_v1 = vsel %vm920_vm6, %v2381_v11, %v919_v9  ;;  %v2438_v36 = vadd.f32 %v1080_v6, %v927_v37  ;;  %v1077_v6 = vadd.f32 %v1055_v52, %v2803_v60  ;;  %v935_v52 = vsel %vm920_vm6, %v917_v33, %v2383_v24 }
 0x18c   :  { %v2433_v29 = vadd.f32 %v1082_v42, %v928_v1  ;;  %v1089_v42 = vadd.f32 %v1073_v40, %v943_v46  ;;  %v949_v30 = vmul.f32 %v2446_v23, %v935_v52 }
 0x18d   :  { %v1093_v22 = vadd.f32 %v1077_v6, %v947_v31  ;;  %v1081_v31 = vadd.f32 %v2422_v43, %v2806_v53 }
 0x1b4   :  { %v954_v21 = vpop.permute.xlu1 %953 }
 0x1b5   :  { %v956_v58 = vpop.permute.xlu0 %955 }
 0x1b8   :  { %v958_v12 = vpop.permute.xlu1 %957 }
 0x1b9   :  { %v960_v20 = vpop.permute.xlu0 %959 }
 0x1bc   :  { %v2441_v54 = vpop.permute.xlu1 %961 }
 0x1bd   :  { %v2443_v44 = vpop.permute.xlu0 %963 }
 0x1c0   :  { %v2458_v26 = vpop.permute.xlu1 %965 }
 0x1c1   :  { %v2468_v63 = vpop.permute.xlu0 %967 }
 0x1c4   :  { %v970_v15 = vpop.permute.xlu1 %969 }
 0x1c5   :  { %v972_v59 = vpop.permute.xlu0 %971  ;;  %v986_v56 = vsel %vm985_vm9, %v954_v21, %v970_v15  ;;  %v994_v62 = vsel %vm985_vm9, %v970_v15, %v954_v21  ;;  %v936_v21 = vsel %vm920_vm6, %v919_v9, %v2381_v11 }
 0x1c6   :  { %v987_v32 = vsel %vm985_vm9, %v956_v58, %v972_v59  ;;  %v995_v3 = vsel %vm985_vm9, %v972_v59, %v956_v58  ;;  %v1003_v61 = vmul.f32 %v2479_v28, %v994_v62  ;;  %v1099_v17 = vadd.f32 %v1083_v7, %v986_v56 }
 0x1c7   :  { %v1005_v1 = vmul.f32 %v2479_v28, %v995_v3  ;;  %v1101_v37 = vadd.f32 %v1085_v57, %v987_v32  ;;  %v951_v13 = vmul.f32 %v2446_v23, %v936_v21 }
 0x1c8   :  { %v1100_v34 = vadd.f32 %v2396_v8, %v1003_v61  ;;  %1115 = vst [vmem:[%s2605_s2] sm:$0xff] %v1099_v17  ;;  %v974_v58 = vpop.permute.xlu1 %973 }
 0x1c9   :  { %v1102_v51 = vadd.f32 %v2394_v5, %v1005_v1  ;;  %1117 = vst [vmem:[%s2605_s2 + $0x10] sm:$0xff] %v1101_v37  ;;  %v976_v14 = vpop.permute.xlu0 %975  ;;  %v988_v11 = vsel %vm985_vm9, %v958_v12, %v974_v58  ;;  %v996_v8 = vsel %vm985_vm9, %v974_v58, %v958_v12  ;;  %v1097_v43 = vadd.f32 %v1081_v31, %v951_v13 }
 0x1ca   :  { %1116 = vst [vmem:[%s2605_s2 + $0x8] sm:$0xff] %v1100_v34  ;;  %v989_v24 = vsel %vm985_vm9, %v960_v20, %v976_v14  ;;  %v997_v5 = vsel %vm985_vm9, %v976_v14, %v960_v20  ;;  %v1007_v9 = vmul.f32 %v2479_v28, %v996_v8  ;;  %v1103_v33 = vadd.f32 %v1087_v45, %v988_v11 }
 0x1cb   :  { %1118 = vst [vmem:[%s2605_s2 + $0x18] sm:$0xff] %v1102_v51  ;;  %v1009_v12 = vmul.f32 %v2479_v28, %v997_v5  ;;  %v1105_v0 = vadd.f32 %v1089_v42, %v989_v24 }
 0x1cc   :  { %v1104_v41 = vadd.f32 %v2408_v16, %v1007_v9  ;;  %1119 = vst [vmem:[%s2605_s2 + $0x20] sm:$0xff] %v1103_v33  ;;  %v978_v20 = vpop.permute.xlu1 %977 }
 0x1cd   :  { %v1106_v47 = vadd.f32 %v2406_v2, %v1009_v12  ;;  %1121 = vst [vmem:[%s2605_s2 + $0x30] sm:$0xff] %v1105_v0  ;;  %v980_v46 = vpop.permute.xlu0 %979  ;;  %v990_v4 = vsel %vm985_vm9, %v2441_v54, %v978_v20  ;;  %v998_v16 = vsel %vm985_vm9, %v978_v20, %v2441_v54 }
 0x1ce   :  { %1120 = vst [vmem:[%s2605_s2 + $0x28] sm:$0xff] %v1104_v41  ;;  %v991_v2 = vsel %vm985_vm9, %v2443_v44, %v980_v46  ;;  %v999_v23 = vsel %vm985_vm9, %v980_v46, %v2443_v44  ;;  %v1011_v49 = vmul.f32 %v2479_v28, %v998_v16  ;;  %v1107_v40 = vadd.f32 %v1091_v50, %v990_v4 }
 0x1cf   :  { %1122 = vst [vmem:[%s2605_s2 + $0x38] sm:$0xff] %v1106_v47  ;;  %v1013_v54 = vmul.f32 %v2479_v28, %v999_v23  ;;  %v1109_v7 = vadd.f32 %v1093_v22, %v991_v2  ;;  %v1095_v44 = vadd.f32 %v1079_v38, %v949_v30 }
 0x1d0   :  { %v1108_v35 = vadd.f32 %v2420_v48, %v1011_v49  ;;  %1123 = vst [vmem:[%s2605_s2 + $0x40] sm:$0xff] %v1107_v40  ;;  %v982_v39 = vpop.permute.xlu1 %981 }
 0x1d1   :  { %v1110_v15 = vadd.f32 %v2418_v55, %v1013_v54  ;;  %1125 = vst [vmem:[%s2605_s2 + $0x50] sm:$0xff] %v1109_v7  ;;  %v984_v18 = vpop.permute.xlu0 %983  ;;  %v992_v57 = vsel %vm985_vm9, %v2458_v26, %v982_v39  ;;  %v1000_v48 = vsel %vm985_vm9, %v982_v39, %v2458_v26 }
 0x1d2   :  { %1124 = vst [vmem:[%s2605_s2 + $0x48] sm:$0xff] %v1108_v35  ;;  %v993_v55 = vsel %vm985_vm9, %v2468_v63, %v984_v18  ;;  %v1001_v59 = vsel %vm985_vm9, %v984_v18, %v2468_v63  ;;  %v1015_v56 = vmul.f32 %v2479_v28, %v1000_v48  ;;  %v1111_v62 = vadd.f32 %v1095_v44, %v992_v57 }
 0x1d3   :  { %1126 = vst [vmem:[%s2605_s2 + $0x58] sm:$0xff] %v1110_v15  ;;  %v1017_v26 = vmul.f32 %v2479_v28, %v1001_v59  ;;  %v1113_v32 = vadd.f32 %v1097_v43, %v993_v55 }
 0x1d4   :  { %v1112_v3 = vadd.f32 %v2438_v36, %v1015_v56  ;;  %1127 = vst [vmem:[%s2605_s2 + $0x60] sm:$0xff] %v1111_v62 }
 0x1d5   :  { %v1114_v61 = vadd.f32 %v2433_v29, %v1017_v26  ;;  %1129 = vst [vmem:[%s2605_s2 + $0x70] sm:$0xff] %v1113_v32 }
 0x1d6   :  { %1128 = vst [vmem:[%s2605_s2 + $0x68] sm:$0xff] %v1112_v3 }
 0x1d7   :  { %1130 = vst [vmem:[%s2605_s2 + $0x78] sm:$0xff] %v1114_v61 }

</bundles_post_ra>
